<compile_context>
chip_gen: v5e
topology: v5e:2x2
jax: 0.10.0
libtpu: 0.0.40
codegen_flags: <defaults>
</compile_context>

<pallas_src>
import functools

import jax
import jax.numpy as jnp
from jax.experimental import pallas as pl
from jax.experimental.pallas import tpu as pltpu

EPS = 1e-6        # module's EPS
BN_EPS = 1e-5     # PyTorch BatchNorm default eps


# ----------------------------------------------------------------------------
# Kernel 1: lane-dense JS-divergence tile
# ----------------------------------------------------------------------------
def _js_kernel(q_ref, kt_ref, j_ref, *, cross_dtype):
    G, L, D = q_ref.shape
    TJ = kt_ref.shape[2]

    q = q_ref[...].astype(jnp.float32)           # (G, L, D)   D on lanes
    kt = kt_ref[...].astype(jnp.float32)         # (G, D, TJ)  TJ on lanes

    # softmax(Q) over the feature axis (lanes).
    pq = jnp.exp(q - jnp.max(q, axis=-1, keepdims=True))
    pq = pq / jnp.sum(pq, axis=-1, keepdims=True)               # (G, L, D)

    # softmax(K) over the feature axis (sublanes of the pre-transposed K).
    pk = jnp.exp(kt - jnp.max(kt, axis=1, keepdims=True))
    pk = pk / jnp.sum(pk, axis=1, keepdims=True)                # (G, D, TJ)

    # Hoisted per-row "self" terms of the rewritten JS divergence.
    sq = jnp.sum(pq * jnp.log2(pq + EPS), axis=-1, keepdims=True)   # (G, L, 1)
    sk = jnp.sum(pk * jnp.log2(pk + EPS), axis=1, keepdims=True)    # (G, 1, TJ)

    # Cross term sum_d m*log2(m+EPS), accumulated on a lane-dense (L, TJ) slab.
    # bf16 on v6e/v7x (bf16 EUP), f32 accumulator; f32 everywhere on v5e.
    pq_c = pq.astype(cross_dtype)
    pk_c = pk.astype(cross_dtype)
    acc = jnp.zeros((G, L, TJ), jnp.float32)
    # Static loop over d: each iteration's (G, L, TJ) temporaries are consumed
    # immediately into acc.  (For very large D a VMEM-scratch + fori_loop
    # variant would bound live ranges further; D is typically <= 128.)
    for d in range(D):
        m = 0.5 * (pq_c[:, :, d:d + 1] + pk_c[:, d:d + 1, :])       # (G, L, TJ)
        acc = acc + (m * jnp.log2(m + EPS)).astype(jnp.float32)

    j_ref[...] = (0.5 * sq + 0.5 * sk - acc).astype(j_ref.dtype)


# ----------------------------------------------------------------------------
# Kernel 2: fused off-diag BatchNorm apply + QUBO energy + Hd
# ----------------------------------------------------------------------------
def _energy_hd_kernel(j_ref, jmean_ref, jrstd_ref, h_ref, xr_ref, xc_ref,
                      v_ref, hd_ref):
    G, L, _ = j_ref.shape

    J = j_ref[...].astype(jnp.float32)           # (G, L, L) raw (un-normalized)
    jmean = jmean_ref[...]                       # (G, 1, 1) per-head off-diag mean
    jrstd = jrstd_ref[...]                       # (G, 1, 1) per-head off-diag rstd
    h = h_ref[...]                               # (G, L, 1) post-BatchNorm h
    x_row = xr_ref[...]                          # (G, 1, L) binary assignment
    x_col = xc_ref[...]                          # (G, L, 1) same assignment
    v = v_ref[...].astype(jnp.float32)           # (G, L, D)

    # Off-diagonal BatchNorm of J applied on the fly (diagonal kept raw) --
    # fused here so the normalized J never round-trips through HBM.
    rows = jax.lax.broadcasted_iota(jnp.int32, (1, L, L), 1)
    cols = jax.lax.broadcasted_iota(jnp.int32, (1, L, L), 2)
    Jn = jnp.where(rows == cols, J, (J - jmean) * jrstd)

    # hi = -Vn*log2(Vn), recomputed from V (cheaper than an HBM write+read).
    vn = v / (jnp.sum(v, axis=-1, keepdims=True) + EPS)
    vc = jnp.clip(vn, EPS, 1.0)
    hi = -vc * jnp.log2(vc)                                       # (G, L, D)

    # TODO(synk): exact per-variable decomposition of the kaiwu_sa backend's
    # energy_function is unavailable; use the standard QUBO per-variable
    # contribution H_i = x_i * (h_i + sum_j J_ij x_j).
    jx = jnp.sum(Jn * x_row, axis=-1, keepdims=True)              # (G, L, 1)
    H = x_col * (h + jx)                                          # (G, L, 1)

    # Matches the reference: divides by the *post*-BatchNorm h.
    hd_ref[...] = ((H / h) * hi).astype(hd_ref.dtype)


# ----------------------------------------------------------------------------
# Plain-JAX glue: training-mode BatchNorm (gamma=1, beta=0)
# ----------------------------------------------------------------------------
def _bn_1d(x):
    # x: (B, C, N) -- BatchNorm1d(C), batch statistics, biased variance.
    mean = jnp.mean(x, axis=(0, 2), keepdims=True)
    var = jnp.mean(jnp.square(x - mean), axis=(0, 2), keepdims=True)
    return (x - mean) * jax.lax.rsqrt(var + BN_EPS)


def _bn_2d(x):
    # x: (B, C, H, W) -- BatchNorm2d(C), batch statistics, biased variance.
    mean = jnp.mean(x, axis=(0, 2, 3), keepdims=True)
    var = jnp.mean(jnp.square(x - mean), axis=(0, 2, 3), keepdims=True)
    return (x - mean) * jax.lax.rsqrt(var + BN_EPS)


# ----------------------------------------------------------------------------
# Generation-aware sizing (static, trace-time)
# ----------------------------------------------------------------------------
def _vmem_limit_bytes():
    cap = 0
    try:
        info = pltpu.get_tpu_info()
        cap = int(getattr(info, "vmem_capacity_bytes", 0) or 0)
    except Exception:
        cap = 0
    if cap <= 0:
        cap = 64 * 1024 * 1024          # conservative fallback (v7x per-core VMEM)
    return (3 * cap) // 4               # headroom for compiler scratch / spills


def _cross_dtype():
    # bf16 EUP/VPU path exists on v6e and newer; v5e and older stay f32.
    try:
        kind = jax.devices()[0].device_kind.lower()
    except Exception:
        return jnp.float32
    if "v6" in kind or "v7" in kind or "tpu7" in kind:
        return jnp.bfloat16
    return jnp.float32


def _k1_per_head_bytes(L, D, TJ, cbytes):
    blocks = 2 * 4 * (L * D + D * TJ + L * TJ)          # double-buffered Q/K^T/J blocks
    interm = 4 * (2 * L * D + 2 * D * TJ + 2 * L * TJ + L + TJ) \
        + cbytes * (L * D + D * TJ + 2 * L * TJ)        # softmaxes, acc, cross-term temps
    return blocks + interm


def _k2_per_head_bytes(L, D):
    blocks = 2 * 4 * (L * L + 2 * L * D + 3 * L + 2)    # double-buffered in/out blocks
    interm = 4 * (2 * L * L + 3 * L * D + 4 * L)
    return blocks + interm


def _pick_jtile(L, D, budget, cbytes):
    # TJ must equal L (full dim) or be a multiple of 128 (tiling constraint).
    cands = [t for t in range(1, L + 1)
             if L % t == 0 and (t == L or t % 128 == 0)]
    for t in sorted(cands, reverse=True):
        if _k1_per_head_bytes(L, D, t, cbytes) <= budget:
            return t
    return min(cands)


def _pick_group(n, per_head_bytes, budget, min_steps=1):
    best = 1
    for g in range(1, n + 1):
        if n % g:
            continue
        if n // g < min_steps:
            break
        if g * per_head_bytes <= budget:
            best = g
    return best


# ----------------------------------------------------------------------------
# Forward pass
# ----------------------------------------------------------------------------
def qama_multihead_attention_forward(Q, K, V):
    B, Hh, L, D = Q.shape
    BH = B * Hh

    # Keep the native dtype; upcast inside the kernels after the DMA.
    q = Q.reshape(BH, L, D)
    k_t = jnp.swapaxes(K.reshape(BH, L, D), 1, 2)        # (BH, D, L): lane-dense j axis
    v = V.reshape(BH, L, D)

    vmem_limit = _vmem_limit_bytes()
    cdt = _cross_dtype()
    cbytes = jnp.dtype(cdt).itemsize

    # -------- kernel 1: raw J tiles --------
    budget1 = (3 * vmem_limit) // 5
    TJ = _pick_jtile(L, D, budget1, cbytes)
    nj = L // TJ
    # Keep >= 2 grid steps so a 2-TensorCore chip (v7x) never idles a core.
    min_steps0 = 1 if nj >= 2 else min(2, BH)
    G1 = _pick_group(BH, _k1_per_head_bytes(L, D, TJ, cbytes), budget1, min_steps0)

    j_flat = pl.pallas_call(
        functools.partial(_js_kernel, cross_dtype=cdt),
        out_shape=jax.ShapeDtypeStruct((BH, L, L), jnp.float32),
        grid=(BH // G1, nj),
        in_specs=[
            pl.BlockSpec((G1, L, D), lambda g, j: (g, 0, 0)),    # Q rows
            pl.BlockSpec((G1, D, TJ), lambda g, j: (g, 0, j)),   # K^T column tile
        ],
        out_specs=pl.BlockSpec((G1, L, TJ), lambda g, j: (g, 0, j)),
        compiler_params=pltpu.CompilerParams(
            dimension_semantics=("parallel", "parallel"),
            vmem_limit_bytes=vmem_limit,
        ),
    )(q, k_t)

    # -------- h from V (cheap plain-JAX reduce; kept out of the hot kernel) ----
    vf = v.astype(jnp.float32)
    vn = vf / (jnp.sum(vf, axis=-1, keepdims=True) + EPS)
    vc = jnp.clip(vn, EPS, 1.0)
    h = jnp.sum(-vc * jnp.log2(vc), axis=-1)             # (BH, L)

    # -------- off-diag BatchNorm stats of J (single fused pass) --------
    # The (J - mean)*rstd apply (with the diagonal exception) happens in kernel 2.
    J4 = j_flat.reshape(B, Hh, L, L)
    mask = 1.0 - jnp.eye(L, dtype=jnp.float32)
    cnt = max(B * L * (L - 1), 1)
    s1 = jnp.sum(J4 * mask, axis=(0, 2, 3))
    s2 = jnp.sum(jnp.square(J4) * mask, axis=(0, 2, 3))
    j_mean = s1 / cnt
    j_var = jnp.maximum(s2 / cnt - jnp.square(j_mean), 0.0)
    j_rstd = jax.lax.rsqrt(j_var + BN_EPS)
    j_mean_bh = jnp.broadcast_to(j_mean[None, :], (B, Hh)).reshape(BH, 1, 1)
    j_rstd_bh = jnp.broadcast_to(j_rstd[None, :], (B, Hh)).reshape(BH, 1, 1)

    # -------- h BatchNorm (cross-batch stats) --------
    h = _bn_1d(h.reshape(B, Hh, L)).reshape(BH, L)

    # -------- QUBO solve placeholder --------
    # TODO(synk): the kaiwu_sa quantum-annealing QUBO solver (solver.solve) has
    # no Pallas equivalent; use a deterministic greedy assignment on the linear
    # terms as a stand-in binary solution.
    x = (h < 0.0).astype(jnp.float32)                     # (BH, L)

    # -------- kernel 2: energy + Hd --------
    budget2 = (3 * vmem_limit) // 5
    G2 = _pick_group(BH, _k2_per_head_bytes(L, D), budget2, min(2, BH))

    hd_pre = pl.pallas_call(
        _energy_hd_kernel,
        out_shape=jax.ShapeDtypeStruct((BH, L, D), jnp.float32),
        grid=(BH // G2,),
        in_specs=[
            pl.BlockSpec((G2, L, L), lambda i: (i, 0, 0)),   # raw J
            pl.BlockSpec((G2, 1, 1), lambda i: (i, 0, 0)),   # off-diag mean
            pl.BlockSpec((G2, 1, 1), lambda i: (i, 0, 0)),   # off-diag rstd
            pl.BlockSpec((G2, L, 1), lambda i: (i, 0, 0)),   # h (post-BN)
            pl.BlockSpec((G2, 1, L), lambda i: (i, 0, 0)),   # x (lane-dense)
            pl.BlockSpec((G2, L, 1), lambda i: (i, 0, 0)),   # x (sublane-aligned)
            pl.BlockSpec((G2, L, D), lambda i: (i, 0, 0)),   # V
        ],
        out_specs=pl.BlockSpec((G2, L, D), lambda i: (i, 0, 0)),
        compiler_params=pltpu.CompilerParams(
            dimension_semantics=("parallel",),
            vmem_limit_bytes=vmem_limit,
        ),
    )(j_flat, j_mean_bh, j_rstd_bh, h.reshape(BH, L, 1),
      x.reshape(BH, 1, L), x.reshape(BH, L, 1), v)

    Hd = _bn_2d(-hd_pre.reshape(B, Hh, L, D))              # BatchNorm2d(-Hd)
    return Hd


if __name__ == "__main__":
    key = jax.random.PRNGKey(0)
    kq, kk, kv = jax.random.split(key, 3)
    B, NUM_HEADS, L, D = 2, 4, 8, 16
    Q = jax.random.normal(kq, (B, NUM_HEADS, L, D), dtype=jnp.float32)
    K = jax.random.normal(kk, (B, NUM_HEADS, L, D), dtype=jnp.float32)
    V = jax.random.uniform(kv, (B, NUM_HEADS, L, D), dtype=jnp.float32)

    fwd = jax.jit(qama_multihead_attention_forward)
    out = jax.block_until_ready(fwd(Q, K, V))
    assert out.shape == (B, NUM_HEADS, L, D)
    assert out.dtype == jnp.float32
    print("KERNEL_OK")
</pallas_src>

<mosaic_0001>
module attributes {stable_mosaic.version = 11 : i64} {
  func.func @_js_kernel(%arg0: i32, %arg1: i32, %arg2: memref<4x8x16xf32, #tpu.memory_space<vmem>>, %arg3: memref<4x16x8xf32, #tpu.memory_space<vmem>>, %arg4: memref<4x8x8xf32, #tpu.memory_space<vmem>>) attributes {dimension_semantics = [#tpu.dimension_semantics<parallel>, #tpu.dimension_semantics<parallel>], iteration_bounds = array<i64: 2, 1>, scalar_prefetch = 0 : i64, scratch_operands = 0 : i64, tpu.core_type = #tpu.core_type<tc>, window_params = [{transform_indices = @transform_0, window_bounds = array<i64: 4, 8, 16>}, {transform_indices = @transform_1, window_bounds = array<i64: 4, 16, 8>}, {transform_indices = @transform_2, window_bounds = array<i64: 4, 8, 8>}]} {
    %c0 = arith.constant 0 : index
    %c0_0 = arith.constant 0 : index
    %c0_1 = arith.constant 0 : index
    %0 = vector.load %arg2[%c0, %c0_0, %c0_1] : memref<4x8x16xf32, #tpu.memory_space<vmem>>, vector<4x8x16xf32>
    %c0_2 = arith.constant 0 : index
    %c0_3 = arith.constant 0 : index
    %c0_4 = arith.constant 0 : index
    %1 = vector.load %arg3[%c0_2, %c0_3, %c0_4] : memref<4x16x8xf32, #tpu.memory_space<vmem>>, vector<4x16x8xf32>
    %cst = arith.constant dense<0xFF800000> : vector<4x8xf32>
    %2 = vector.multi_reduction <maximumf>, %0, %cst [2] : vector<4x8x16xf32> to vector<4x8xf32>
    %3 = vector.shape_cast %2 : vector<4x8xf32> to vector<4x8x1xf32>
    %4 = vector.broadcast %3 : vector<4x8x1xf32> to vector<4x8x16xf32>
    %5 = arith.subf %0, %4 : vector<4x8x16xf32>
    %6 = math.exp %5 : vector<4x8x16xf32>
    %cst_5 = arith.constant dense<0.000000e+00> : vector<4x8xf32>
    %7 = vector.multi_reduction <add>, %6, %cst_5 [2] : vector<4x8x16xf32> to vector<4x8xf32>
    %8 = vector.shape_cast %7 : vector<4x8xf32> to vector<4x8x1xf32>
    %9 = vector.broadcast %8 : vector<4x8x1xf32> to vector<4x8x16xf32>
    %10 = arith.divf %6, %9 : vector<4x8x16xf32>
    %cst_6 = arith.constant dense<0xFF800000> : vector<4x8xf32>
    %11 = vector.multi_reduction <maximumf>, %1, %cst_6 [1] : vector<4x16x8xf32> to vector<4x8xf32>
    %12 = vector.shape_cast %11 : vector<4x8xf32> to vector<4x1x8xf32>
    %13 = vector.broadcast %12 : vector<4x1x8xf32> to vector<4x16x8xf32>
    %14 = arith.subf %1, %13 : vector<4x16x8xf32>
    %15 = math.exp %14 : vector<4x16x8xf32>
    %cst_7 = arith.constant dense<0.000000e+00> : vector<4x8xf32>
    %16 = vector.multi_reduction <add>, %15, %cst_7 [1] : vector<4x16x8xf32> to vector<4x8xf32>
    %17 = vector.shape_cast %16 : vector<4x8xf32> to vector<4x1x8xf32>
    %18 = vector.broadcast %17 : vector<4x1x8xf32> to vector<4x16x8xf32>
    %19 = arith.divf %15, %18 : vector<4x16x8xf32>
    %cst_8 = arith.constant 9.99999997E-7 : f32
    %20 = vector.broadcast %cst_8 : f32 to vector<4x8x16xf32>
    %21 = arith.addf %10, %20 : vector<4x8x16xf32>
    %22 = math.log %21 : vector<4x8x16xf32>
    %cst_9 = arith.constant 2.000000e+00 : f32
    %23 = math.log %cst_9 : f32
    %24 = vector.broadcast %23 : f32 to vector<4x8x16xf32>
    %25 = arith.divf %22, %24 : vector<4x8x16xf32>
    %26 = arith.mulf %10, %25 : vector<4x8x16xf32>
    %cst_10 = arith.constant dense<0.000000e+00> : vector<4x8xf32>
    %27 = vector.multi_reduction <add>, %26, %cst_10 [2] : vector<4x8x16xf32> to vector<4x8xf32>
    %28 = vector.shape_cast %27 : vector<4x8xf32> to vector<4x8x1xf32>
    %cst_11 = arith.constant 9.99999997E-7 : f32
    %29 = vector.broadcast %cst_11 : f32 to vector<4x16x8xf32>
    %30 = arith.addf %19, %29 : vector<4x16x8xf32>
    %31 = math.log %30 : vector<4x16x8xf32>
    %cst_12 = arith.constant 2.000000e+00 : f32
    %32 = math.log %cst_12 : f32
    %33 = vector.broadcast %32 : f32 to vector<4x16x8xf32>
    %34 = arith.divf %31, %33 : vector<4x16x8xf32>
    %35 = arith.mulf %19, %34 : vector<4x16x8xf32>
    %cst_13 = arith.constant dense<0.000000e+00> : vector<4x8xf32>
    %36 = vector.multi_reduction <add>, %35, %cst_13 [1] : vector<4x16x8xf32> to vector<4x8xf32>
    %37 = vector.shape_cast %36 : vector<4x8xf32> to vector<4x1x8xf32>
    %cst_14 = arith.constant 0.000000e+00 : f32
    %38 = vector.broadcast %cst_14 : f32 to vector<4x8x8xf32>
    %39 = vector.extract_strided_slice %10 {offsets = [0, 0, 0], sizes = [4, 8, 1], strides = [1, 1, 1]} : vector<4x8x16xf32> to vector<4x8x1xf32>
    %40 = vector.extract_strided_slice %19 {offsets = [0, 0, 0], sizes = [4, 1, 8], strides = [1, 1, 1]} : vector<4x16x8xf32> to vector<4x1x8xf32>
    %41 = vector.broadcast %39 : vector<4x8x1xf32> to vector<4x8x8xf32>
    %42 = vector.broadcast %40 : vector<4x1x8xf32> to vector<4x8x8xf32>
    %43 = arith.addf %41, %42 : vector<4x8x8xf32>
    %cst_15 = arith.constant 5.000000e-01 : f32
    %44 = vector.broadcast %cst_15 : f32 to vector<4x8x8xf32>
    %45 = arith.mulf %44, %43 : vector<4x8x8xf32>
    %cst_16 = arith.constant 9.99999997E-7 : f32
    %46 = vector.broadcast %cst_16 : f32 to vector<4x8x8xf32>
    %47 = arith.addf %45, %46 : vector<4x8x8xf32>
    %48 = math.log %47 : vector<4x8x8xf32>
    %cst_17 = arith.constant 2.000000e+00 : f32
    %49 = math.log %cst_17 : f32
    %50 = vector.broadcast %49 : f32 to vector<4x8x8xf32>
    %51 = arith.divf %48, %50 : vector<4x8x8xf32>
    %52 = arith.mulf %45, %51 : vector<4x8x8xf32>
    %53 = arith.addf %38, %52 : vector<4x8x8xf32>
    %54 = vector.extract_strided_slice %10 {offsets = [0, 0, 1], sizes = [4, 8, 1], strides = [1, 1, 1]} : vector<4x8x16xf32> to vector<4x8x1xf32>
    %55 = vector.extract_strided_slice %19 {offsets = [0, 1, 0], sizes = [4, 1, 8], strides = [1, 1, 1]} : vector<4x16x8xf32> to vector<4x1x8xf32>
    %56 = vector.broadcast %54 : vector<4x8x1xf32> to vector<4x8x8xf32>
    %57 = vector.broadcast %55 : vector<4x1x8xf32> to vector<4x8x8xf32>
    %58 = arith.addf %56, %57 : vector<4x8x8xf32>
    %cst_18 = arith.constant 5.000000e-01 : f32
    %59 = vector.broadcast %cst_18 : f32 to vector<4x8x8xf32>
    %60 = arith.mulf %59, %58 : vector<4x8x8xf32>
    %cst_19 = arith.constant 9.99999997E-7 : f32
    %61 = vector.broadcast %cst_19 : f32 to vector<4x8x8xf32>
    %62 = arith.addf %60, %61 : vector<4x8x8xf32>
    %63 = math.log %62 : vector<4x8x8xf32>
    %cst_20 = arith.constant 2.000000e+00 : f32
    %64 = math.log %cst_20 : f32
    %65 = vector.broadcast %64 : f32 to vector<4x8x8xf32>
    %66 = arith.divf %63, %65 : vector<4x8x8xf32>
    %67 = arith.mulf %60, %66 : vector<4x8x8xf32>
    %68 = arith.addf %53, %67 : vector<4x8x8xf32>
    %69 = vector.extract_strided_slice %10 {offsets = [0, 0, 2], sizes = [4, 8, 1], strides = [1, 1, 1]} : vector<4x8x16xf32> to vector<4x8x1xf32>
    %70 = vector.extract_strided_slice %19 {offsets = [0, 2, 0], sizes = [4, 1, 8], strides = [1, 1, 1]} : vector<4x16x8xf32> to vector<4x1x8xf32>
    %71 = vector.broadcast %69 : vector<4x8x1xf32> to vector<4x8x8xf32>
    %72 = vector.broadcast %70 : vector<4x1x8xf32> to vector<4x8x8xf32>
    %73 = arith.addf %71, %72 : vector<4x8x8xf32>
    %cst_21 = arith.constant 5.000000e-01 : f32
    %74 = vector.broadcast %cst_21 : f32 to vector<4x8x8xf32>
    %75 = arith.mulf %74, %73 : vector<4x8x8xf32>
    %cst_22 = arith.constant 9.99999997E-7 : f32
    %76 = vector.broadcast %cst_22 : f32 to vector<4x8x8xf32>
    %77 = arith.addf %75, %76 : vector<4x8x8xf32>
    %78 = math.log %77 : vector<4x8x8xf32>
    %cst_23 = arith.constant 2.000000e+00 : f32
    %79 = math.log %cst_23 : f32
    %80 = vector.broadcast %79 : f32 to vector<4x8x8xf32>
    %81 = arith.divf %78, %80 : vector<4x8x8xf32>
    %82 = arith.mulf %75, %81 : vector<4x8x8xf32>
    %83 = arith.addf %68, %82 : vector<4x8x8xf32>
    %84 = vector.extract_strided_slice %10 {offsets = [0, 0, 3], sizes = [4, 8, 1], strides = [1, 1, 1]} : vector<4x8x16xf32> to vector<4x8x1xf32>
    %85 = vector.extract_strided_slice %19 {offsets = [0, 3, 0], sizes = [4, 1, 8], strides = [1, 1, 1]} : vector<4x16x8xf32> to vector<4x1x8xf32>
    %86 = vector.broadcast %84 : vector<4x8x1xf32> to vector<4x8x8xf32>
    %87 = vector.broadcast %85 : vector<4x1x8xf32> to vector<4x8x8xf32>
    %88 = arith.addf %86, %87 : vector<4x8x8xf32>
    %cst_24 = arith.constant 5.000000e-01 : f32
    %89 = vector.broadcast %cst_24 : f32 to vector<4x8x8xf32>
    %90 = arith.mulf %89, %88 : vector<4x8x8xf32>
    %cst_25 = arith.constant 9.99999997E-7 : f32
    %91 = vector.broadcast %cst_25 : f32 to vector<4x8x8xf32>
    %92 = arith.addf %90, %91 : vector<4x8x8xf32>
    %93 = math.log %92 : vector<4x8x8xf32>
    %cst_26 = arith.constant 2.000000e+00 : f32
    %94 = math.log %cst_26 : f32
    %95 = vector.broadcast %94 : f32 to vector<4x8x8xf32>
    %96 = arith.divf %93, %95 : vector<4x8x8xf32>
    %97 = arith.mulf %90, %96 : vector<4x8x8xf32>
    %98 = arith.addf %83, %97 : vector<4x8x8xf32>
    %99 = vector.extract_strided_slice %10 {offsets = [0, 0, 4], sizes = [4, 8, 1], strides = [1, 1, 1]} : vector<4x8x16xf32> to vector<4x8x1xf32>
    %100 = vector.extract_strided_slice %19 {offsets = [0, 4, 0], sizes = [4, 1, 8], strides = [1, 1, 1]} : vector<4x16x8xf32> to vector<4x1x8xf32>
    %101 = vector.broadcast %99 : vector<4x8x1xf32> to vector<4x8x8xf32>
    %102 = vector.broadcast %100 : vector<4x1x8xf32> to vector<4x8x8xf32>
    %103 = arith.addf %101, %102 : vector<4x8x8xf32>
    %cst_27 = arith.constant 5.000000e-01 : f32
    %104 = vector.broadcast %cst_27 : f32 to vector<4x8x8xf32>
    %105 = arith.mulf %104, %103 : vector<4x8x8xf32>
    %cst_28 = arith.constant 9.99999997E-7 : f32
    %106 = vector.broadcast %cst_28 : f32 to vector<4x8x8xf32>
    %107 = arith.addf %105, %106 : vector<4x8x8xf32>
    %108 = math.log %107 : vector<4x8x8xf32>
    %cst_29 = arith.constant 2.000000e+00 : f32
    %109 = math.log %cst_29 : f32
    %110 = vector.broadcast %109 : f32 to vector<4x8x8xf32>
    %111 = arith.divf %108, %110 : vector<4x8x8xf32>
    %112 = arith.mulf %105, %111 : vector<4x8x8xf32>
    %113 = arith.addf %98, %112 : vector<4x8x8xf32>
    %114 = vector.extract_strided_slice %10 {offsets = [0, 0, 5], sizes = [4, 8, 1], strides = [1, 1, 1]} : vector<4x8x16xf32> to vector<4x8x1xf32>
    %115 = vector.extract_strided_slice %19 {offsets = [0, 5, 0], sizes = [4, 1, 8], strides = [1, 1, 1]} : vector<4x16x8xf32> to vector<4x1x8xf32>
    %116 = vector.broadcast %114 : vector<4x8x1xf32> to vector<4x8x8xf32>
    %117 = vector.broadcast %115 : vector<4x1x8xf32> to vector<4x8x8xf32>
    %118 = arith.addf %116, %117 : vector<4x8x8xf32>
    %cst_30 = arith.constant 5.000000e-01 : f32
    %119 = vector.broadcast %cst_30 : f32 to vector<4x8x8xf32>
    %120 = arith.mulf %119, %118 : vector<4x8x8xf32>
    %cst_31 = arith.constant 9.99999997E-7 : f32
    %121 = vector.broadcast %cst_31 : f32 to vector<4x8x8xf32>
    %122 = arith.addf %120, %121 : vector<4x8x8xf32>
    %123 = math.log %122 : vector<4x8x8xf32>
    %cst_32 = arith.constant 2.000000e+00 : f32
    %124 = math.log %cst_32 : f32
    %125 = vector.broadcast %124 : f32 to vector<4x8x8xf32>
    %126 = arith.divf %123, %125 : vector<4x8x8xf32>
    %127 = arith.mulf %120, %126 : vector<4x8x8xf32>
    %128 = arith.addf %113, %127 : vector<4x8x8xf32>
    %129 = vector.extract_strided_slice %10 {offsets = [0, 0, 6], sizes = [4, 8, 1], strides = [1, 1, 1]} : vector<4x8x16xf32> to vector<4x8x1xf32>
    %130 = vector.extract_strided_slice %19 {offsets = [0, 6, 0], sizes = [4, 1, 8], strides = [1, 1, 1]} : vector<4x16x8xf32> to vector<4x1x8xf32>
    %131 = vector.broadcast %129 : vector<4x8x1xf32> to vector<4x8x8xf32>
    %132 = vector.broadcast %130 : vector<4x1x8xf32> to vector<4x8x8xf32>
    %133 = arith.addf %131, %132 : vector<4x8x8xf32>
    %cst_33 = arith.constant 5.000000e-01 : f32
    %134 = vector.broadcast %cst_33 : f32 to vector<4x8x8xf32>
    %135 = arith.mulf %134, %133 : vector<4x8x8xf32>
    %cst_34 = arith.constant 9.99999997E-7 : f32
    %136 = vector.broadcast %cst_34 : f32 to vector<4x8x8xf32>
    %137 = arith.addf %135, %136 : vector<4x8x8xf32>
    %138 = math.log %137 : vector<4x8x8xf32>
    %cst_35 = arith.constant 2.000000e+00 : f32
    %139 = math.log %cst_35 : f32
    %140 = vector.broadcast %139 : f32 to vector<4x8x8xf32>
    %141 = arith.divf %138, %140 : vector<4x8x8xf32>
    %142 = arith.mulf %135, %141 : vector<4x8x8xf32>
    %143 = arith.addf %128, %142 : vector<4x8x8xf32>
    %144 = vector.extract_strided_slice %10 {offsets = [0, 0, 7], sizes = [4, 8, 1], strides = [1, 1, 1]} : vector<4x8x16xf32> to vector<4x8x1xf32>
    %145 = vector.extract_strided_slice %19 {offsets = [0, 7, 0], sizes = [4, 1, 8], strides = [1, 1, 1]} : vector<4x16x8xf32> to vector<4x1x8xf32>
    %146 = vector.broadcast %144 : vector<4x8x1xf32> to vector<4x8x8xf32>
    %147 = vector.broadcast %145 : vector<4x1x8xf32> to vector<4x8x8xf32>
    %148 = arith.addf %146, %147 : vector<4x8x8xf32>
    %cst_36 = arith.constant 5.000000e-01 : f32
    %149 = vector.broadcast %cst_36 : f32 to vector<4x8x8xf32>
    %150 = arith.mulf %149, %148 : vector<4x8x8xf32>
    %cst_37 = arith.constant 9.99999997E-7 : f32
    %151 = vector.broadcast %cst_37 : f32 to vector<4x8x8xf32>
    %152 = arith.addf %150, %151 : vector<4x8x8xf32>
    %153 = math.log %152 : vector<4x8x8xf32>
    %cst_38 = arith.constant 2.000000e+00 : f32
    %154 = math.log %cst_38 : f32
    %155 = vector.broadcast %154 : f32 to vector<4x8x8xf32>
    %156 = arith.divf %153, %155 : vector<4x8x8xf32>
    %157 = arith.mulf %150, %156 : vector<4x8x8xf32>
    %158 = arith.addf %143, %157 : vector<4x8x8xf32>
    %159 = vector.extract_strided_slice %10 {offsets = [0, 0, 8], sizes = [4, 8, 1], strides = [1, 1, 1]} : vector<4x8x16xf32> to vector<4x8x1xf32>
    %160 = vector.extract_strided_slice %19 {offsets = [0, 8, 0], sizes = [4, 1, 8], strides = [1, 1, 1]} : vector<4x16x8xf32> to vector<4x1x8xf32>
    %161 = vector.broadcast %159 : vector<4x8x1xf32> to vector<4x8x8xf32>
    %162 = vector.broadcast %160 : vector<4x1x8xf32> to vector<4x8x8xf32>
    %163 = arith.addf %161, %162 : vector<4x8x8xf32>
    %cst_39 = arith.constant 5.000000e-01 : f32
    %164 = vector.broadcast %cst_39 : f32 to vector<4x8x8xf32>
    %165 = arith.mulf %164, %163 : vector<4x8x8xf32>
    %cst_40 = arith.constant 9.99999997E-7 : f32
    %166 = vector.broadcast %cst_40 : f32 to vector<4x8x8xf32>
    %167 = arith.addf %165, %166 : vector<4x8x8xf32>
    %168 = math.log %167 : vector<4x8x8xf32>
    %cst_41 = arith.constant 2.000000e+00 : f32
    %169 = math.log %cst_41 : f32
    %170 = vector.broadcast %169 : f32 to vector<4x8x8xf32>
    %171 = arith.divf %168, %170 : vector<4x8x8xf32>
    %172 = arith.mulf %165, %171 : vector<4x8x8xf32>
    %173 = arith.addf %158, %172 : vector<4x8x8xf32>
    %174 = vector.extract_strided_slice %10 {offsets = [0, 0, 9], sizes = [4, 8, 1], strides = [1, 1, 1]} : vector<4x8x16xf32> to vector<4x8x1xf32>
    %175 = vector.extract_strided_slice %19 {offsets = [0, 9, 0], sizes = [4, 1, 8], strides = [1, 1, 1]} : vector<4x16x8xf32> to vector<4x1x8xf32>
    %176 = vector.broadcast %174 : vector<4x8x1xf32> to vector<4x8x8xf32>
    %177 = vector.broadcast %175 : vector<4x1x8xf32> to vector<4x8x8xf32>
    %178 = arith.addf %176, %177 : vector<4x8x8xf32>
    %cst_42 = arith.constant 5.000000e-01 : f32
    %179 = vector.broadcast %cst_42 : f32 to vector<4x8x8xf32>
    %180 = arith.mulf %179, %178 : vector<4x8x8xf32>
    %cst_43 = arith.constant 9.99999997E-7 : f32
    %181 = vector.broadcast %cst_43 : f32 to vector<4x8x8xf32>
    %182 = arith.addf %180, %181 : vector<4x8x8xf32>
    %183 = math.log %182 : vector<4x8x8xf32>
    %cst_44 = arith.constant 2.000000e+00 : f32
    %184 = math.log %cst_44 : f32
    %185 = vector.broadcast %184 : f32 to vector<4x8x8xf32>
    %186 = arith.divf %183, %185 : vector<4x8x8xf32>
    %187 = arith.mulf %180, %186 : vector<4x8x8xf32>
    %188 = arith.addf %173, %187 : vector<4x8x8xf32>
    %189 = vector.extract_strided_slice %10 {offsets = [0, 0, 10], sizes = [4, 8, 1], strides = [1, 1, 1]} : vector<4x8x16xf32> to vector<4x8x1xf32>
    %190 = vector.extract_strided_slice %19 {offsets = [0, 10, 0], sizes = [4, 1, 8], strides = [1, 1, 1]} : vector<4x16x8xf32> to vector<4x1x8xf32>
    %191 = vector.broadcast %189 : vector<4x8x1xf32> to vector<4x8x8xf32>
    %192 = vector.broadcast %190 : vector<4x1x8xf32> to vector<4x8x8xf32>
    %193 = arith.addf %191, %192 : vector<4x8x8xf32>
    %cst_45 = arith.constant 5.000000e-01 : f32
    %194 = vector.broadcast %cst_45 : f32 to vector<4x8x8xf32>
    %195 = arith.mulf %194, %193 : vector<4x8x8xf32>
    %cst_46 = arith.constant 9.99999997E-7 : f32
    %196 = vector.broadcast %cst_46 : f32 to vector<4x8x8xf32>
    %197 = arith.addf %195, %196 : vector<4x8x8xf32>
    %198 = math.log %197 : vector<4x8x8xf32>
    %cst_47 = arith.constant 2.000000e+00 : f32
    %199 = math.log %cst_47 : f32
    %200 = vector.broadcast %199 : f32 to vector<4x8x8xf32>
    %201 = arith.divf %198, %200 : vector<4x8x8xf32>
    %202 = arith.mulf %195, %201 : vector<4x8x8xf32>
    %203 = arith.addf %188, %202 : vector<4x8x8xf32>
    %204 = vector.extract_strided_slice %10 {offsets = [0, 0, 11], sizes = [4, 8, 1], strides = [1, 1, 1]} : vector<4x8x16xf32> to vector<4x8x1xf32>
    %205 = vector.extract_strided_slice %19 {offsets = [0, 11, 0], sizes = [4, 1, 8], strides = [1, 1, 1]} : vector<4x16x8xf32> to vector<4x1x8xf32>
    %206 = vector.broadcast %204 : vector<4x8x1xf32> to vector<4x8x8xf32>
    %207 = vector.broadcast %205 : vector<4x1x8xf32> to vector<4x8x8xf32>
    %208 = arith.addf %206, %207 : vector<4x8x8xf32>
    %cst_48 = arith.constant 5.000000e-01 : f32
    %209 = vector.broadcast %cst_48 : f32 to vector<4x8x8xf32>
    %210 = arith.mulf %209, %208 : vector<4x8x8xf32>
    %cst_49 = arith.constant 9.99999997E-7 : f32
    %211 = vector.broadcast %cst_49 : f32 to vector<4x8x8xf32>
    %212 = arith.addf %210, %211 : vector<4x8x8xf32>
    %213 = math.log %212 : vector<4x8x8xf32>
    %cst_50 = arith.constant 2.000000e+00 : f32
    %214 = math.log %cst_50 : f32
    %215 = vector.broadcast %214 : f32 to vector<4x8x8xf32>
    %216 = arith.divf %213, %215 : vector<4x8x8xf32>
    %217 = arith.mulf %210, %216 : vector<4x8x8xf32>
    %218 = arith.addf %203, %217 : vector<4x8x8xf32>
    %219 = vector.extract_strided_slice %10 {offsets = [0, 0, 12], sizes = [4, 8, 1], strides = [1, 1, 1]} : vector<4x8x16xf32> to vector<4x8x1xf32>
    %220 = vector.extract_strided_slice %19 {offsets = [0, 12, 0], sizes = [4, 1, 8], strides = [1, 1, 1]} : vector<4x16x8xf32> to vector<4x1x8xf32>
    %221 = vector.broadcast %219 : vector<4x8x1xf32> to vector<4x8x8xf32>
    %222 = vector.broadcast %220 : vector<4x1x8xf32> to vector<4x8x8xf32>
    %223 = arith.addf %221, %222 : vector<4x8x8xf32>
    %cst_51 = arith.constant 5.000000e-01 : f32
    %224 = vector.broadcast %cst_51 : f32 to vector<4x8x8xf32>
    %225 = arith.mulf %224, %223 : vector<4x8x8xf32>
    %cst_52 = arith.constant 9.99999997E-7 : f32
    %226 = vector.broadcast %cst_52 : f32 to vector<4x8x8xf32>
    %227 = arith.addf %225, %226 : vector<4x8x8xf32>
    %228 = math.log %227 : vector<4x8x8xf32>
    %cst_53 = arith.constant 2.000000e+00 : f32
    %229 = math.log %cst_53 : f32
    %230 = vector.broadcast %229 : f32 to vector<4x8x8xf32>
    %231 = arith.divf %228, %230 : vector<4x8x8xf32>
    %232 = arith.mulf %225, %231 : vector<4x8x8xf32>
    %233 = arith.addf %218, %232 : vector<4x8x8xf32>
    %234 = vector.extract_strided_slice %10 {offsets = [0, 0, 13], sizes = [4, 8, 1], strides = [1, 1, 1]} : vector<4x8x16xf32> to vector<4x8x1xf32>
    %235 = vector.extract_strided_slice %19 {offsets = [0, 13, 0], sizes = [4, 1, 8], strides = [1, 1, 1]} : vector<4x16x8xf32> to vector<4x1x8xf32>
    %236 = vector.broadcast %234 : vector<4x8x1xf32> to vector<4x8x8xf32>
    %237 = vector.broadcast %235 : vector<4x1x8xf32> to vector<4x8x8xf32>
    %238 = arith.addf %236, %237 : vector<4x8x8xf32>
    %cst_54 = arith.constant 5.000000e-01 : f32
    %239 = vector.broadcast %cst_54 : f32 to vector<4x8x8xf32>
    %240 = arith.mulf %239, %238 : vector<4x8x8xf32>
    %cst_55 = arith.constant 9.99999997E-7 : f32
    %241 = vector.broadcast %cst_55 : f32 to vector<4x8x8xf32>
    %242 = arith.addf %240, %241 : vector<4x8x8xf32>
    %243 = math.log %242 : vector<4x8x8xf32>
    %cst_56 = arith.constant 2.000000e+00 : f32
    %244 = math.log %cst_56 : f32
    %245 = vector.broadcast %244 : f32 to vector<4x8x8xf32>
    %246 = arith.divf %243, %245 : vector<4x8x8xf32>
    %247 = arith.mulf %240, %246 : vector<4x8x8xf32>
    %248 = arith.addf %233, %247 : vector<4x8x8xf32>
    %249 = vector.extract_strided_slice %10 {offsets = [0, 0, 14], sizes = [4, 8, 1], strides = [1, 1, 1]} : vector<4x8x16xf32> to vector<4x8x1xf32>
    %250 = vector.extract_strided_slice %19 {offsets = [0, 14, 0], sizes = [4, 1, 8], strides = [1, 1, 1]} : vector<4x16x8xf32> to vector<4x1x8xf32>
    %251 = vector.broadcast %249 : vector<4x8x1xf32> to vector<4x8x8xf32>
    %252 = vector.broadcast %250 : vector<4x1x8xf32> to vector<4x8x8xf32>
    %253 = arith.addf %251, %252 : vector<4x8x8xf32>
    %cst_57 = arith.constant 5.000000e-01 : f32
    %254 = vector.broadcast %cst_57 : f32 to vector<4x8x8xf32>
    %255 = arith.mulf %254, %253 : vector<4x8x8xf32>
    %cst_58 = arith.constant 9.99999997E-7 : f32
    %256 = vector.broadcast %cst_58 : f32 to vector<4x8x8xf32>
    %257 = arith.addf %255, %256 : vector<4x8x8xf32>
    %258 = math.log %257 : vector<4x8x8xf32>
    %cst_59 = arith.constant 2.000000e+00 : f32
    %259 = math.log %cst_59 : f32
    %260 = vector.broadcast %259 : f32 to vector<4x8x8xf32>
    %261 = arith.divf %258, %260 : vector<4x8x8xf32>
    %262 = arith.mulf %255, %261 : vector<4x8x8xf32>
    %263 = arith.addf %248, %262 : vector<4x8x8xf32>
    %264 = vector.extract_strided_slice %10 {offsets = [0, 0, 15], sizes = [4, 8, 1], strides = [1, 1, 1]} : vector<4x8x16xf32> to vector<4x8x1xf32>
    %265 = vector.extract_strided_slice %19 {offsets = [0, 15, 0], sizes = [4, 1, 8], strides = [1, 1, 1]} : vector<4x16x8xf32> to vector<4x1x8xf32>
    %266 = vector.broadcast %264 : vector<4x8x1xf32> to vector<4x8x8xf32>
    %267 = vector.broadcast %265 : vector<4x1x8xf32> to vector<4x8x8xf32>
    %268 = arith.addf %266, %267 : vector<4x8x8xf32>
    %cst_60 = arith.constant 5.000000e-01 : f32
    %269 = vector.broadcast %cst_60 : f32 to vector<4x8x8xf32>
    %270 = arith.mulf %269, %268 : vector<4x8x8xf32>
    %cst_61 = arith.constant 9.99999997E-7 : f32
    %271 = vector.broadcast %cst_61 : f32 to vector<4x8x8xf32>
    %272 = arith.addf %270, %271 : vector<4x8x8xf32>
    %273 = math.log %272 : vector<4x8x8xf32>
    %cst_62 = arith.constant 2.000000e+00 : f32
    %274 = math.log %cst_62 : f32
    %275 = vector.broadcast %274 : f32 to vector<4x8x8xf32>
    %276 = arith.divf %273, %275 : vector<4x8x8xf32>
    %277 = arith.mulf %270, %276 : vector<4x8x8xf32>
    %278 = arith.addf %263, %277 : vector<4x8x8xf32>
    %cst_63 = arith.constant 5.000000e-01 : f32
    %279 = vector.broadcast %cst_63 : f32 to vector<4x8x1xf32>
    %280 = arith.mulf %279, %28 : vector<4x8x1xf32>
    %cst_64 = arith.constant 5.000000e-01 : f32
    %281 = vector.broadcast %cst_64 : f32 to vector<4x1x8xf32>
    %282 = arith.mulf %281, %37 : vector<4x1x8xf32>
    %283 = vector.broadcast %280 : vector<4x8x1xf32> to vector<4x8x8xf32>
    %284 = vector.broadcast %282 : vector<4x1x8xf32> to vector<4x8x8xf32>
    %285 = arith.addf %283, %284 : vector<4x8x8xf32>
    %286 = arith.subf %285, %278 : vector<4x8x8xf32>
    %c0_65 = arith.constant 0 : index
    %c0_66 = arith.constant 0 : index
    %c0_67 = arith.constant 0 : index
    %287 = vector.load %arg4[%c0_65, %c0_66, %c0_67] : memref<4x8x8xf32, #tpu.memory_space<vmem>>, vector<4x8x8xf32>
    tpu.vector_store %arg4[%c0_65, %c0_66, %c0_67], %286 {strides = array<i32>} : memref<4x8x8xf32, #tpu.memory_space<vmem>>, vector<4x8x8xf32>,
    return
  }
  func.func @transform_0(%arg0: i32, %arg1: i32) -> (i32, i32, i32) {
    %c0_i32 = arith.constant 0 : i32
    %c0_i32_0 = arith.constant 0 : i32
    %c0_i32_1 = arith.constant 0 : i32
    return %arg0, %c0_i32, %c0_i32_0 : i32, i32, i32
  }
  func.func @transform_1(%arg0: i32, %arg1: i32) -> (i32, i32, i32) {
    %c0_i32 = arith.constant 0 : i32
    %c0_i32_0 = arith.constant 0 : i32
    return %arg0, %c0_i32, %arg1 : i32, i32, i32
  }
  func.func @transform_2(%arg0: i32, %arg1: i32) -> (i32, i32, i32) {
    %c0_i32 = arith.constant 0 : i32
    %c0_i32_0 = arith.constant 0 : i32
    return %arg0, %c0_i32, %arg1 : i32, i32, i32
  }
}

module attributes {stable_mosaic.version = 11 : i64} {
  func.func @_energy_hd_kernel(%arg0: i32, %arg1: memref<4x8x8xf32, #tpu.memory_space<vmem>>, %arg2: memref<4x1x1xf32, #tpu.memory_space<vmem>>, %arg3: memref<4x1x1xf32, #tpu.memory_space<vmem>>, %arg4: memref<4x8x1xf32, #tpu.memory_space<vmem>>, %arg5: memref<4x1x8xf32, #tpu.memory_space<vmem>>, %arg6: memref<4x8x1xf32, #tpu.memory_space<vmem>>, %arg7: memref<4x8x16xf32, #tpu.memory_space<vmem>>, %arg8: memref<4x8x16xf32, #tpu.memory_space<vmem>>) attributes {dimension_semantics = [#tpu.dimension_semantics<parallel>], iteration_bounds = array<i64: 2>, scalar_prefetch = 0 : i64, scratch_operands = 0 : i64, tpu.core_type = #tpu.core_type<tc>, window_params = [{transform_indices = @transform_0, window_bounds = array<i64: 4, 8, 8>}, {transform_indices = @transform_1, window_bounds = array<i64: 4, 1, 1>}, {transform_indices = @transform_2, window_bounds = array<i64: 4, 1, 1>}, {transform_indices = @transform_3, window_bounds = array<i64: 4, 8, 1>}, {transform_indices = @transform_4, window_bounds = array<i64: 4, 1, 8>}, {transform_indices = @transform_5, window_bounds = array<i64: 4, 8, 1>}, {transform_indices = @transform_6, window_bounds = array<i64: 4, 8, 16>}, {transform_indices = @transform_7, window_bounds = array<i64: 4, 8, 16>}]} {
    %c0 = arith.constant 0 : index
    %c0_0 = arith.constant 0 : index
    %c0_1 = arith.constant 0 : index
    %0 = vector.load %arg1[%c0, %c0_0, %c0_1] : memref<4x8x8xf32, #tpu.memory_space<vmem>>, vector<4x8x8xf32>
    %c0_2 = arith.constant 0 : index
    %c0_3 = arith.constant 0 : index
    %c0_4 = arith.constant 0 : index
    %1 = vector.load %arg2[%c0_2, %c0_3, %c0_4] : memref<4x1x1xf32, #tpu.memory_space<vmem>>, vector<4x1x1xf32>
    %c0_5 = arith.constant 0 : index
    %c0_6 = arith.constant 0 : index
    %c0_7 = arith.constant 0 : index
    %2 = vector.load %arg3[%c0_5, %c0_6, %c0_7] : memref<4x1x1xf32, #tpu.memory_space<vmem>>, vector<4x1x1xf32>
    %c0_8 = arith.constant 0 : index
    %c0_9 = arith.constant 0 : index
    %c0_10 = arith.constant 0 : index
    %3 = vector.load %arg4[%c0_8, %c0_9, %c0_10] : memref<4x8x1xf32, #tpu.memory_space<vmem>>, vector<4x8x1xf32>
    %c0_11 = arith.constant 0 : index
    %c0_12 = arith.constant 0 : index
    %c0_13 = arith.constant 0 : index
    %4 = vector.load %arg5[%c0_11, %c0_12, %c0_13] : memref<4x1x8xf32, #tpu.memory_space<vmem>>, vector<4x1x8xf32>
    %c0_14 = arith.constant 0 : index
    %c0_15 = arith.constant 0 : index
    %c0_16 = arith.constant 0 : index
    %5 = vector.load %arg6[%c0_14, %c0_15, %c0_16] : memref<4x8x1xf32, #tpu.memory_space<vmem>>, vector<4x8x1xf32>
    %c0_17 = arith.constant 0 : index
    %c0_18 = arith.constant 0 : index
    %c0_19 = arith.constant 0 : index
    %6 = vector.load %arg7[%c0_17, %c0_18, %c0_19] : memref<4x8x16xf32, #tpu.memory_space<vmem>>, vector<4x8x16xf32>
    %7 = tpu.iota {dimensions = array<i32: 1>} : vector<1x8x8xi32>
    %8 = tpu.iota {dimensions = array<i32: 2>} : vector<1x8x8xi32>
    %9 = arith.cmpi eq, %7, %8 : vector<1x8x8xi32>
    %10 = vector.broadcast %1 : vector<4x1x1xf32> to vector<4x8x8xf32>
    %11 = arith.subf %0, %10 : vector<4x8x8xf32>
    %12 = vector.broadcast %2 : vector<4x1x1xf32> to vector<4x8x8xf32>
    %13 = arith.mulf %11, %12 : vector<4x8x8xf32>
    %14 = vector.shape_cast %9 : vector<1x8x8xi1> to vector<1x8x8xi1>
    %15 = vector.broadcast %14 : vector<1x8x8xi1> to vector<4x8x8xi1>
    %16 = arith.select %15, %0, %13 : vector<4x8x8xi1>, vector<4x8x8xf32>
    %cst = arith.constant dense<0.000000e+00> : vector<4x8xf32>
    %17 = vector.multi_reduction <add>, %6, %cst [2] : vector<4x8x16xf32> to vector<4x8xf32>
    %18 = vector.shape_cast %17 : vector<4x8xf32> to vector<4x8x1xf32>
    %cst_20 = arith.constant 9.99999997E-7 : f32
    %19 = vector.broadcast %cst_20 : f32 to vector<4x8x1xf32>
    %20 = arith.addf %18, %19 : vector<4x8x1xf32>
    %21 = vector.broadcast %20 : vector<4x8x1xf32> to vector<4x8x16xf32>
    %22 = arith.divf %6, %21 : vector<4x8x16xf32>
    %cst_21 = arith.constant 9.99999997E-7 : f32
    %cst_22 = arith.constant 1.000000e+00 : f32
    %23 = vector.broadcast %cst_21 : f32 to vector<4x8x16xf32>
    %24 = arith.maximumf %23, %22 : vector<4x8x16xf32>
    %25 = vector.broadcast %cst_22 : f32 to vector<4x8x16xf32>
    %26 = arith.minimumf %25, %24 : vector<4x8x16xf32>
    %cst_23 = arith.constant 0.000000e+00 : f32
    %27 = vector.broadcast %cst_23 : f32 to vector<4x8x16xf32>
    %28 = arith.subf %27, %26 : vector<4x8x16xf32>
    %29 = math.log %26 : vector<4x8x16xf32>
    %cst_24 = arith.constant 2.000000e+00 : f32
    %30 = math.log %cst_24 : f32
    %31 = vector.broadcast %30 : f32 to vector<4x8x16xf32>
    %32 = arith.divf %29, %31 : vector<4x8x16xf32>
    %33 = arith.mulf %28, %32 : vector<4x8x16xf32>
    %34 = vector.broadcast %4 : vector<4x1x8xf32> to vector<4x8x8xf32>
    %35 = arith.mulf %16, %34 : vector<4x8x8xf32>
    %cst_25 = arith.constant dense<0.000000e+00> : vector<4x8xf32>
    %36 = vector.multi_reduction <add>, %35, %cst_25 [2] : vector<4x8x8xf32> to vector<4x8xf32>
    %37 = vector.shape_cast %36 : vector<4x8xf32> to vector<4x8x1xf32>
    %38 = arith.addf %3, %37 : vector<4x8x1xf32>
    %39 = arith.mulf %5, %38 : vector<4x8x1xf32>
    %40 = arith.divf %39, %3 : vector<4x8x1xf32>
    %41 = vector.broadcast %40 : vector<4x8x1xf32> to vector<4x8x16xf32>
    %42 = arith.mulf %41, %33 : vector<4x8x16xf32>
    %c0_26 = arith.constant 0 : index
    %c0_27 = arith.constant 0 : index
    %c0_28 = arith.constant 0 : index
    %43 = vector.load %arg8[%c0_26, %c0_27, %c0_28] : memref<4x8x16xf32, #tpu.memory_space<vmem>>, vector<4x8x16xf32>
    tpu.vector_store %arg8[%c0_26, %c0_27, %c0_28], %42 {strides = array<i32>} : memref<4x8x16xf32, #tpu.memory_space<vmem>>, vector<4x8x16xf32>,
    return
  }
  func.func @transform_0(%arg0: i32) -> (i32, i32, i32) {
    %c0_i32 = arith.constant 0 : i32
    %c0_i32_0 = arith.constant 0 : i32
    %c0_i32_1 = arith.constant 0 : i32
    return %arg0, %c0_i32, %c0_i32_0 : i32, i32, i32
  }
  func.func @transform_1(%arg0: i32) -> (i32, i32, i32) {
    %c0_i32 = arith.constant 0 : i32
    %c0_i32_0 = arith.constant 0 : i32
    %c0_i32_1 = arith.constant 0 : i32
    return %arg0, %c0_i32, %c0_i32_0 : i32, i32, i32
  }
  func.func @transform_2(%arg0: i32) -> (i32, i32, i32) {
    %c0_i32 = arith.constant 0 : i32
    %c0_i32_0 = arith.constant 0 : i32
    %c0_i32_1 = arith.constant 0 : i32
    return %arg0, %c0_i32, %c0_i32_0 : i32, i32, i32
  }
  func.func @transform_3(%arg0: i32) -> (i32, i32, i32) {
    %c0_i32 = arith.constant 0 : i32
    %c0_i32_0 = arith.constant 0 : i32
    %c0_i32_1 = arith.constant 0 : i32
    return %arg0, %c0_i32, %c0_i32_0 : i32, i32, i32
  }
  func.func @transform_4(%arg0: i32) -> (i32, i32, i32) {
    %c0_i32 = arith.constant 0 : i32
    %c0_i32_0 = arith.constant 0 : i32
    %c0_i32_1 = arith.constant 0 : i32
    return %arg0, %c0_i32, %c0_i32_0 : i32, i32, i32
  }
  func.func @transform_5(%arg0: i32) -> (i32, i32, i32) {
    %c0_i32 = arith.constant 0 : i32
    %c0_i32_0 = arith.constant 0 : i32
    %c0_i32_1 = arith.constant 0 : i32
    return %arg0, %c0_i32, %c0_i32_0 : i32, i32, i32
  }
  func.func @transform_6(%arg0: i32) -> (i32, i32, i32) {
    %c0_i32 = arith.constant 0 : i32
    %c0_i32_0 = arith.constant 0 : i32
    %c0_i32_1 = arith.constant 0 : i32
    return %arg0, %c0_i32, %c0_i32_0 : i32, i32, i32
  }
  func.func @transform_7(%arg0: i32) -> (i32, i32, i32) {
    %c0_i32 = arith.constant 0 : i32
    %c0_i32_0 = arith.constant 0 : i32
    %c0_i32_1 = arith.constant 0 : i32
    return %arg0, %c0_i32, %c0_i32_0 : i32, i32, i32
  }
}

</mosaic_0001>

<bundles_post_ra>
// kernel: qama_multihead_attention_forward.3
= control target key start
LH: loop header
LB: loop body
LE: loop exit
PB: predicated region body
PF: predicated region fallthrough
CT: control target
= control target key end

     0   :  { %s977_s24 = smov 0   ;;  %s1151_s0 = inlined_call_operand.vmem [shape: f32[8,8,8], index: 0, kind: input, shape index: {}]   ;;  %s1152_s1 = inlined_call_operand.vmem [shape: f32[8,1,1], index: 1, kind: input, shape index: {}]   ;;  %s1153_s2 = inlined_call_operand.vmem [shape: f32[8,1,1], index: 2, kind: input, shape index: {}]   ;;  %s1154_s3 = inlined_call_operand.vmem [shape: f32[8,8,1], index: 3, kind: input, shape index: {}]   ;;  %s1155_s4 = inlined_call_operand.vmem [shape: f32[8,1,8], index: 4, kind: input, shape index: {}]   ;;  %s1156_s5 = inlined_call_operand.vmem [shape: f32[8,8,1], index: 5, kind: input, shape index: {}]   ;;  %s1157_s6 = inlined_call_operand.vmem [shape: f32[8,8,16], index: 6, kind: input, shape index: {}]   ;;  %s1158_s7 = inlined_call_operand.vmem [shape: f32[8,8,16], index: 7, kind: output, shape index: {}]  }
   0x1 LB: > { %s856_s25 = sadd.s32 4294967295, %s933_s24   ;;  %p860_p0 = scmp.ge.s32.totalorder %s933_s24, 1  ;;  %s933_s24 = sphi %s977_s24, %s17_s24  }
   0x2   : > { %p301_p1 = scmp.lt.s32.totalorder %s933_s24, 3 }
   0x4   : > { %p302_p2 = pnand %p860_p0, %p301_p1 }
   0x5   : > { %s861_s26 = sshll.u32 (!%p302_p2), %s856_s25, 2 }
   0x6   : > { %305 = sbr.rel (%p302_p2) target bundleno = 391 (0x187), region = 48  ;;  %p361_p3 = scmp.lt.s32.totalorder (!%p302_p2), %s861_s26, 7 }
   0xb   : > { %v935_v0 = vmov 0   ;;  %s1174_s26 = smov (!%p361_p3, %s861_s26), 7  ;;  %vm500_vm0 = vcmask 130048   ;;  %v433_v14 = vlaneseq  ;;  %vm628_vm2 = vcmask 64512  }
   0xc   : > { %887 = vset.pattern.permute.xlu1 %v935_v0  ;;  %886 = vset.pattern.permute.xlu0 %v935_v0  ;;  %s369_s29 = scalar_lea.vmem %s1152_s1, %s1174_s26  ;;  %s374_s9 = scalar_lea.vmem %s1153_s2, %s1174_s26 }
   0xd   : > { %888 = vset.pattern.permute.xlu2 %v935_v0  ;;  %v889_v1 = vld [vmem:[%s369_s29 + $0x2] ss:$0 sm:$0xff]  ;;  %v890_v2 = vld [vmem:[%s369_s29] ss:$0 sm:$0xff]  ;;  %v895_v3 = vld [vmem:[%s369_s29 + $0x3] ss:$0 sm:$0xff]  ;;  %s994_s12 = scalar_lea.vmem %s1155_s4, %s1174_s26 }
   0xe   : > { %455 = vperm.xlu1 %887, %v889_v1   ;;  %447 = vperm.xlu0 %886, %v890_v2   ;;  %v891_v4 = vld [vmem:[%s374_s9] ss:$0 sm:$0xff]  ;;  %v892_v5 = vld [vmem:[%s369_s29 + $0x1] ss:$0 sm:$0xff]  ;;  %v893_v7 = vld [vmem:[%s374_s9 + $0x3] ss:$0 sm:$0xff] }
   0xf   : > { %459 = vperm.xlu2 %888, %v895_v3   ;;  %v896_v6 = vld [vmem:[%s374_s9 + $0x1] ss:$0 sm:$0xff]  ;;  %v894_v8 = vld [vmem:[%s374_s9 + $0x2] ss:$0 sm:$0xff]  ;;  %s996_s13 = sshll.u32 %s1174_s26, 3  ;;  %v434_v18 = vshrl.u32 %v433_v14, 7 }
  0x10   : > { %s1002_s16 = scalar_lea.vmem %s1157_s6, %s996_s13  ;;  %s364_s19 = scalar_lea.vmem %s1151_s0, %s996_s13  ;;  %v436_v19 = vand.u32 127, %v433_v14  ;;  %v897_v23 = vld [vmem:[%s994_s12] ss:$0 sm:$0xff]  ;;  %v898_v29 = vld [vmem:[%s994_s12 + $0x1] ss:$0 sm:$0xff] }
  0x11   : > { %v1005_v9 = vld [vmem:[%s1002_s16] sm:$0xff]  ;;  %v1010_v11 = vld [vmem:[%s1002_s16 + $0x8] sm:$0xff]  ;;  %v408_v30 = vld [vmem:[%s364_s19 + $0x18] sm:$0xff]  ;;  %s380_s22 = scalar_lea.vmem %s1154_s3, %s996_s13  ;;  %s1070_s26 = scalar_lea.vmem %s1156_s5, %s996_s13 }
  0x12   : > { %v501_v10 = vsel %vm500_vm0, %v1005_v9, 0.0  ;;  %v504_v12 = vsel %vm500_vm0, %v1010_v11, 0.0  ;;  %v405_v17 = vld [vmem:[%s364_s19] sm:$0xff]  ;;  %v406_v21 = vld [vmem:[%s364_s19 + $0x8] sm:$0xff]  ;;  %vm437_vm1 = vcmp.eq.s32.totalorder %v434_v18, %v436_v19  ;;  %v407_v33 = vld [vmem:[%s364_s19 + $0x10] sm:$0xff]  ;;  %s403_s29 = scalar_lea.vmem %s1158_s7, %s996_s13 }
  0x13   : > { %v900_v40 = vld [vmem:[%s994_s12 + $0x3] ss:$0 sm:$0xff]  ;;  %v899_v44 = vld [vmem:[%s994_s12 + $0x2] ss:$0 sm:$0xff]  ;;  %v1031_v52 = vld [vmem:[%s1002_s16 + $0x18] sm:$0xff] }
  0x14   : > { %v1034_v53 = vld [vmem:[%s1002_s16 + $0x10] sm:$0xff]  ;;  %v510_v54 = vsel %vm500_vm0, %v1031_v52, 0.0  ;;  %v417_v56 = vld [vmem:[%s380_s22] sm:$0xff]  ;;  %v418_v57 = vld [vmem:[%s380_s22 + $0x8] sm:$0xff] }
  0x15   : > { %v507_v55 = vsel %vm500_vm0, %v1034_v53, 0.0  ;;  %901 = vrcp.f32 %v417_v56  ;;  %v1044_v59 = vld [vmem:[%s380_s22 + $0x18] sm:$0xff]  ;;  %v1046_v60 = vld [vmem:[%s380_s22 + $0x10] sm:$0xff]  ;;  %vm654_vm3 = vweird.f32 %v417_v56  ;;  %vm669_vm6 = vweird.f32 %v418_v57 }
  0x16   : > { %475 = vperm.xlu1 %887, %v891_v4   ;;  %451 = vperm.xlu0 %886, %v892_v5   ;;  %903 = vrcp.f32 %v418_v57  ;;  %v675_v18 = vand.u32 2147483648, %v418_v57  ;;  %vm699_vm10 = vweird.f32 %v1044_v59  ;;  %vm684_vm13 = vweird.f32 %v1046_v60 }
  0x17   : > { %479 = vperm.xlu2 %888, %v896_v6   ;;  %905 = vrcp.f32 %v1044_v59 }
  0x18   : > { %907 = vrcp.f32 %v1046_v60 }
  0x1b   : > { %v902_v58 = vpop.eup %901 }
  0x1c   : > { %v650_v61 = vmul.f32 %v902_v58, %v417_v56  ;;  %v904_v62 = vpop.eup %903  ;;  %vm655_vm4 = vweird.f32 %v902_v58 }
  0x1d   : > { %v665_v0 = vmul.f32 %v904_v62, %v418_v57  ;;  %v1050_v1 = vpop.eup %905  ;;  %vm1060_vm5 = vmor %vm654_vm3, %vm655_vm4  ;;  %vm670_vm7 = vweird.f32 %v904_v62 }
  0x1e   : > { %487 = vperm.xlu1 %887, %v893_v7   ;;  %483 = vperm.xlu0 %886, %v894_v8   ;;  %v651_v63 = vsub.f32 1.0, %v650_v61  ;;  %v1052_v2 = vpop.eup %907  ;;  %v695_v5 = vmul.f32 %v1050_v1, %v1044_v59  ;;  %v660_v7 = vand.u32 2147483648, %v417_v56  ;;  %vm1074_vm9 = vmor %vm669_vm6, %vm670_vm7  ;;  %vm700_vm11 = vweird.f32 %v1050_v1 }
  0x1f   : > { %v666_v4 = vsub.f32 1.0, %v665_v0  ;;  %v680_v8 = vmul.f32 %v1052_v2, %v1046_v60  ;;  %vm685_vm14 = vweird.f32 %v1052_v2  ;;  %vm1096_vm15 = vmor %vm699_vm10, %vm700_vm11 }
  0x20   : > { %v652_v3 = vmul.f32 %v902_v58, %v651_v63 }
  0x21   : > { %v681_v19 = vsub.f32 1.0, %v680_v8 }
  0x40   : > { %502 = vadd.xlane.f32.xlu2 %v501_v10  ;;  %v653_v10 = vadd.f32 %v902_v58, %v652_v3 }
  0x48   : > { %505 = vadd.xlane.f32.xlu0 %v504_v12  ;;  %v658_v12 = vand.u32 2147483647, %v417_v56 }
  0x4a   : > { %vm659_vm8 = vcmp.eq.f32.partialorder %v658_v12, 8.507059e+37 }
  0x69   : > { %v460_v15 = vpop.permute.xlu2 %459 }
  0x6a   : > { %v465_v36 = vsub.f32 %v408_v30, %v460_v15 }
  0x71   : > { %v480_v27 = vpop.permute.xlu2 %479 }
  0x80   : > { %v456_v13 = vpop.permute.xlu1 %455  ;;  %v448_v16 = vpop.permute.xlu0 %447 }
  0x81   : > { %v462_v20 = vsub.f32 %v405_v17, %v448_v16  ;;  %v464_v38 = vsub.f32 %v407_v33, %v456_v13  ;;  %v667_v13 = vmul.f32 %v904_v62, %v666_v4  ;;  %v696_v16 = vsub.f32 1.0, %v695_v5 }
  0x88   : > { %v476_v22 = vpop.permute.xlu1 %475  ;;  %v452_v25 = vpop.permute.xlu0 %451 }
  0x89   : > { %v490_v24 = vmul.f32 %v476_v22, %v462_v20  ;;  %v463_v26 = vsub.f32 %v406_v21, %v452_v25  ;;  %v657_v20 = vsel %vm1060_vm5, %v902_v58, %v653_v10  ;;  %v425_v25 = vld [vmem:[%s1070_s26] sm:$0xff] }
  0x8b   : > { %v496_v28 = vsel %vm437_vm1, %v405_v17, %v490_v24  ;;  %v491_v31 = vmul.f32 %v480_v27, %v463_v26  ;;  %v661_v17 = vor.u32 1.1754944e-38, %v660_v7  ;;  %v697_v24 = vmul.f32 %v1050_v1, %v696_v16 }
  0x8c   : > { %v624_v32 = vmul.f32 %v897_v23, %v496_v28  ;;  %v673_v23 = vand.u32 2147483647, %v418_v57  ;;  %v676_v28 = vor.u32 1.1754944e-38, %v675_v18 }
  0x8d   : > { %v497_v35 = vsel %vm437_vm1, %v406_v21, %v491_v31  ;;  %v668_v21 = vadd.f32 %v904_v62, %v667_v13  ;;  %v662_v27 = vsel %vm659_vm8, %v661_v17, %v657_v20 }
  0x8e   : > { %v629_v34 = vsel %vm628_vm2, %v624_v32, 0.0  ;;  %v625_v37 = vmul.f32 %v898_v29, %v497_v35  ;;  %v682_v29 = vmul.f32 %v1052_v2, %v681_v19  ;;  %vm674_vm12 = vcmp.eq.f32.partialorder %v673_v23, 8.507059e+37 }
  0x8f   : > { %630 = vadd.xlane.f32.xlu2 %v629_v34  ;;  %v672_v31 = vsel %vm1074_vm9, %v904_v62, %v668_v21  ;;  %v705_v32 = vand.u32 2147483648, %v1044_v59  ;;  %v426_v34 = vld [vmem:[%s1070_s26 + $0x8] sm:$0xff] }
  0x90   : > { %v488_v39 = vpop.permute.xlu1 %487  ;;  %v484_v42 = vpop.permute.xlu0 %483  ;;  %v632_v43 = vsel %vm628_vm2, %v625_v37, 0.0  ;;  %v698_v37 = vadd.f32 %v1050_v1, %v697_v24 }
  0x91   : > { %v493_v41 = vmul.f32 %v488_v39, %v465_v36  ;;  %v492_v45 = vmul.f32 %v484_v42, %v464_v38  ;;  %633 = vadd.xlane.f32.xlu0 %v632_v43  ;;  %v690_v36 = vand.u32 2147483648, %v1046_v60  ;;  %v703_v38 = vand.u32 2147483647, %v1044_v59 }
  0x93   : > { %v499_v46 = vsel %vm437_vm1, %v408_v30, %v493_v41  ;;  %v498_v47 = vsel %vm437_vm1, %v407_v33, %v492_v45  ;;  %v688_v41 = vand.u32 2147483647, %v1046_v60  ;;  %vm1102_vm1 = vmor %vm684_vm13, %vm685_vm14 }
  0x94   : > { %v627_v48 = vmul.f32 %v900_v40, %v499_v46  ;;  %v626_v49 = vmul.f32 %v899_v44, %v498_v47  ;;  %v683_v40 = vadd.f32 %v1052_v2, %v682_v29  ;;  %v677_v44 = vsel %vm674_vm12, %v676_v28, %v672_v31 }
  0x95   : > { %v706_v47 = vor.u32 1.1754944e-38, %v705_v32  ;;  %vm689_vm3 = vcmp.eq.f32.partialorder %v688_v41, 8.507059e+37  ;;  %v936_v41 = vmov 0.6931472  }
  0x96   : > { %v638_v50 = vsel %vm628_vm2, %v627_v48, 0.0  ;;  %v635_v51 = vsel %vm628_vm2, %v626_v49, 0.0  ;;  %v691_v48 = vor.u32 1.1754944e-38, %v690_v36  ;;  %v702_v49 = vsel %vm1096_vm15, %v1050_v1, %v698_v37 }
  0x97   : > { %639 = vadd.xlane.f32.xlu2 %v638_v50  ;;  %636 = vadd.xlane.f32.xlu1 %v635_v51  ;;  %vm704_vm2 = vcmp.eq.f32.partialorder %v703_v38, 8.507059e+37  ;;  %v428_v50 = vld [vmem:[%s1070_s26 + $0x18] sm:$0xff] }
  0x98   : > { %v707_v62 = vsel %vm704_vm2, %v706_v47, %v702_v49 }
  0x9f   : > { %511 = vadd.xlane.f32.xlu2 %v510_v54  ;;  %508 = vadd.xlane.f32.xlu1 %v507_v55  ;;  %v687_v55 = vsel %vm1102_vm1, %v1052_v2, %v683_v40 }
  0xa0   : > { %v692_v0 = vsel %vm689_vm3, %v691_v48, %v687_v55 }
  0xb3   : > { %v1056_v6 = vpop.xlane.xlu2 %502 }
  0xb4   : > { %v513_v5 = vadd.f32 1e-06, %v1056_v6 }
  0xb6   : > { %909 = vrcp.f32 %v513_v5  ;;  %vm522_vm4 = vweird.f32 %v513_v5 }
  0xbb   : > { %v1064_v15 = vpop.xlane.xlu0 %505 }
  0xbc   : > { %v514_v8 = vadd.f32 1e-06, %v1064_v15  ;;  %v528_v15 = vand.u32 2147483648, %v513_v5 }
  0xbe   : > { %vm537_vm8 = vweird.f32 %v514_v8  ;;  %v543_v28 = vand.u32 2147483648, %v514_v8  ;;  %v541_v36 = vand.u32 2147483647, %v514_v8 }
  0xc0   : > { %v544_v42 = vor.u32 1.1754944e-38, %v543_v28  ;;  %vm542_vm2 = vcmp.eq.f32.partialorder %v541_v36, 8.507059e+37 }
 0x102   : > { %v631_v26 = vpop.xlane.xlu2 %630 }
 0x103   : > { %v641_v30 = vadd.f32 %v631_v26, %v417_v56  ;;  %v427_v56 = vld [vmem:[%s1070_s26 + $0x10] sm:$0xff] }
 0x104   : > { %v634_v35 = vpop.xlane.xlu0 %633 }
 0x105   : > { %v645_v33 = vmul.f32 %v641_v30, %v425_v25  ;;  %v642_v39 = vadd.f32 %v634_v35, %v418_v57 }
 0x107   : > { %v663_v43 = vmul.f32 %v662_v27, %v645_v33  ;;  %v646_v46 = vmul.f32 %v642_v39, %v426_v34  ;;  %v526_v27 = vand.u32 2147483647, %v513_v5  ;;  %v529_v34 = vor.u32 1.1754944e-38, %v528_v15 }
 0x109   : > { %711 = vperm.xlu0 %886, %v663_v43   ;;  %v678_v54 = vmul.f32 %v677_v44, %v646_v46  ;;  %vm527_vm12 = vcmp.eq.f32.partialorder %v526_v27, 8.507059e+37 }
 0x10a   : > { %v640_v51 = vpop.xlane.xlu2 %639  ;;  %v637_v57 = vpop.xlane.xlu1 %636 }
 0x10b   : > { %v644_v58 = vadd.f32 %v640_v51, %v1044_v59  ;;  %v643_v61 = vadd.f32 %v637_v57, %v1046_v60  ;;  %716 = vperm.xlu1 %887, %v678_v54   ;;  %v910_v60 = vpop.eup %909 }
 0x10c   : > { %v518_v13 = vmul.f32 %v910_v60, %v513_v5  ;;  %vm523_vm5 = vweird.f32 %v910_v60 }
 0x10d   : > { %v648_v63 = vmul.f32 %v644_v58, %v428_v50  ;;  %v647_v1 = vmul.f32 %v643_v61, %v427_v56  ;;  %vm1118_vm9 = vmor %vm522_vm4, %vm523_vm5 }
 0x10e   : > { %v519_v17 = vsub.f32 1.0, %v518_v13 }
 0x10f   : > { %v708_v3 = vmul.f32 %v707_v62, %v648_v63  ;;  %v693_v4 = vmul.f32 %v692_v0, %v647_v1 }
 0x110   : > { %v520_v6 = vmul.f32 %v910_v60, %v519_v17 }
 0x111   : > { %726 = vperm.xlu0 %886, %v708_v3   ;;  %721 = vperm.xlu2 %888, %v693_v4  }
 0x112   : > { %v509_v7 = vpop.xlane.xlu1 %508  ;;  %v512_v10 = vpop.xlane.xlu2 %511  ;;  %v521_v25 = vadd.f32 %v910_v60, %v520_v6 }
 0x113   : > { %v515_v2 = vadd.f32 1e-06, %v509_v7  ;;  %v516_v59 = vadd.f32 1e-06, %v512_v10 }
 0x114   : > { %v525_v38 = vsel %vm1118_vm9, %v910_v60, %v521_v25 }
 0x115   : > { %911 = vrcp.f32 %v515_v2  ;;  %vm552_vm6 = vweird.f32 %v515_v2  ;;  %v558_v29 = vand.u32 2147483648, %v515_v2  ;;  %v556_v32 = vand.u32 2147483647, %v515_v2 }
 0x116   : > { %913 = vrcp.f32 %v514_v8  ;;  %vm567_vm14 = vweird.f32 %v516_v59  ;;  %v573_v44 = vand.u32 2147483648, %v516_v59  ;;  %v530_v45 = vsel %vm527_vm12, %v529_v34, %v525_v38 }
 0x117   : > { %915 = vrcp.f32 %v516_v59  ;;  %v559_v40 = vor.u32 1.1754944e-38, %v558_v29  ;;  %vm557_vm15 = vcmp.eq.f32.partialorder %v556_v32, 8.507059e+37  ;;  %v571_v48 = vand.u32 2147483647, %v516_v59 }
 0x118   : > { %917 = vrcp.f32 %v936_v41  ;;  %v531_v50 = vmul.f32 %v530_v45, %v1005_v9  ;;  %v574_v55 = vor.u32 1.1754944e-38, %v573_v44 }
 0x119   : > { %vm572_vm4 = vcmp.eq.f32.partialorder %v571_v48, 8.507059e+37 }
 0x11a   : > { %v577_v61 = vmax.f32 %v531_v50, 1e-06 }
 0x11b   : > { %v912_v12 = vpop.eup %911 }
 0x11c   : > { %v914_v14 = vpop.eup %913  ;;  %v548_v16 = vmul.f32 %v912_v12, %v515_v2  ;;  %vm553_vm7 = vweird.f32 %v912_v12  ;;  %v581_v3 = vmin.f32 %v577_v61, 1.0 }
 0x11d   : > { %v533_v18 = vmul.f32 %v914_v14, %v514_v8  ;;  %v916_v19 = vpop.eup %915  ;;  %vm538_vm10 = vweird.f32 %v914_v14  ;;  %vm1122_vm11 = vmor %vm552_vm6, %vm553_vm7 }
 0x11e   : > { %v549_v20 = vsub.f32 1.0, %v548_v16  ;;  %v563_v22 = vmul.f32 %v916_v19, %v516_v59  ;;  %vm1128_vm13 = vmor %vm537_vm8, %vm538_vm10  ;;  %vm568_vm1 = vweird.f32 %v916_v19  ;;  %v918_v54 = vpop.eup %917  ;;  %919 = vlog2.f32 %v581_v3 }
 0x11f   : > { %v534_v21 = vsub.f32 1.0, %v533_v18  ;;  %vm569_vm3 = vmor %vm567_vm14, %vm568_vm1  ;;  %v598_v0 = vmul.f32 0.6931472, %v918_v54  ;;  %vm602_vm5 = vweird.f32 %v918_v54  ;;  %v585_v16 = vsub.f32 0.0, %v581_v3 }
 0x120   : > { %v550_v23 = vmul.f32 %v912_v12, %v549_v20  ;;  %v564_v26 = vsub.f32 1.0, %v563_v22 }
 0x121   : > { %v535_v24 = vmul.f32 %v914_v14, %v534_v21  ;;  %v599_v7 = vsub.f32 1.0, %v598_v0 }
 0x122   : > { %v551_v31 = vadd.f32 %v912_v12, %v550_v23  ;;  %v565_v37 = vmul.f32 %v916_v19, %v564_v26 }
 0x123   : > { %v536_v35 = vadd.f32 %v914_v14, %v535_v24  ;;  %v600_v8 = vmul.f32 %v918_v54, %v599_v7 }
 0x124   : > { %v555_v43 = vsel %vm1122_vm11, %v912_v12, %v551_v31  ;;  %v566_v47 = vadd.f32 %v916_v19, %v565_v37  ;;  %v920_v10 = vpop.eup %919 }
 0x125   : > { %v540_v46 = vsel %vm1128_vm13, %v914_v14, %v536_v35  ;;  %v560_v49 = vsel %vm557_vm15, %v559_v40, %v555_v43  ;;  %v601_v59 = vadd.f32 %v918_v54, %v600_v8  ;;  %v590_v12 = vmul.f32 0.6931472, %v920_v10 }
 0x126   : > { %v545_v51 = vsel %vm542_vm2, %v544_v42, %v540_v46  ;;  %v561_v56 = vmul.f32 %v560_v49, %v1034_v53  ;;  %v570_v57 = vsel %vm569_vm3, %v916_v19, %v566_v47 }
 0x127   : > { %v546_v58 = vmul.f32 %v545_v51, %v1010_v11  ;;  %v575_v62 = vsel %vm572_vm4, %v574_v55, %v570_v57  ;;  %v603_v13 = vsel %vm602_vm5, %v918_v54, %v601_v59 }
 0x128   : > { %v579_v63 = vmax.f32 %v561_v56, 1e-06  ;;  %v576_v4 = vmul.f32 %v575_v62, %v1031_v52  ;;  %v604_v17 = vmul.f32 %v603_v13, %v590_v12 }
 0x129   : > { %v578_v1 = vmax.f32 %v546_v58, 1e-06 }
 0x12a   : > { %v583_v5 = vmin.f32 %v579_v63, 1.0  ;;  %v580_v2 = vmax.f32 %v576_v4, 1e-06  ;;  %v608_v22 = vmul.f32 %v604_v17, %v585_v16 }
 0x12b   : > { %v582_v9 = vmin.f32 %v578_v1, 1.0 }
 0x12c   : > { %921 = vlog2.f32 %v583_v5  ;;  %v584_v53 = vmin.f32 %v580_v2, 1.0  ;;  %v587_v19 = vsub.f32 0.0, %v583_v5 }
 0x12d   : > { %923 = vlog2.f32 %v582_v9  ;;  %v586_v6 = vsub.f32 0.0, %v582_v9 }
 0x12e   : > { %925 = vlog2.f32 %v584_v53  ;;  %v588_v29 = vsub.f32 0.0, %v584_v53 }
 0x132   : > { %v922_v11 = vpop.eup %921 }
 0x133   : > { %v924_v60 = vpop.eup %923  ;;  %v594_v14 = vmul.f32 0.6931472, %v922_v11 }
 0x134   : > { %v592_v52 = vmul.f32 0.6931472, %v924_v60  ;;  %v926_v18 = vpop.eup %925 }
 0x135   : > { %v606_v20 = vmul.f32 %v603_v13, %v594_v14  ;;  %v596_v23 = vmul.f32 0.6931472, %v926_v18 }
 0x136   : > { %v605_v21 = vmul.f32 %v603_v13, %v592_v52 }
 0x137   : > { %v610_v24 = vmul.f32 %v606_v20, %v587_v19  ;;  %v607_v30 = vmul.f32 %v603_v13, %v596_v23 }
 0x138   : > { %v609_v27 = vmul.f32 %v605_v21, %v586_v6 }
 0x139   : > { %v611_v33 = vmul.f32 %v607_v30, %v588_v29 }
 0x16b   : > { %v722_v26 = vpop.permute.xlu2 %721 }
 0x16c   : > { %v731_v32 = vmul.f32 %v722_v26, %v610_v24 }
 0x16e   : > { %735 = vst.msk [vmem:[%s403_s29 + $0x10] sm:$0xff] %vm500_vm0, %v731_v32 }
 0x17b   : > { %v712_v15 = vpop.permute.xlu0 %711 }
 0x17c   : > { %v729_v25 = vmul.f32 %v712_v15, %v608_v22 }
 0x17d   : > { %v717_v28 = vpop.permute.xlu1 %716 }
 0x17e   : > { %733 = vst.msk [vmem:[%s403_s29] sm:$0xff] %vm500_vm0, %v729_v25  ;;  %v730_v31 = vmul.f32 %v717_v28, %v609_v27 }
 0x180   : > { %734 = vst.msk [vmem:[%s403_s29 + $0x8] sm:$0xff] %vm500_vm0, %v730_v31 }
 0x183   : > { %v727_v34 = vpop.permute.xlu0 %726 }
 0x184   : > { %v732_v35 = vmul.f32 %v727_v34, %v611_v33 }
 0x186   : > { %736 = vst.msk [vmem:[%s403_s29 + $0x18] sm:$0xff] %vm500_vm0, %v732_v35 }
 0x187 PF: > { %s17_s24 = sadd.s32 1, %s933_s24  }
 0x188   : > { %p14_p4 = scmp.ge.s32.totalorder %s17_s24, 4  }
 0x18a   :  { %16 = sbr.rel (!%p14_p4) target bundleno = 1 (0x1), region = 96 }

// kernel: qama_multihead_attention_forward.2
= control target key start
LH: loop header
LB: loop body
LE: loop exit
PB: predicated region body
PF: predicated region fallthrough
CT: control target
= control target key end

     0   :  { %s1887_s9 = smov 0   ;;  %s1889_s10 = smov 0   ;;  %s2609_s0 = inlined_call_operand.vmem [shape: f32[8,8,16], index: 0, kind: input, shape index: {}]   ;;  %s2610_s1 = inlined_call_operand.vmem [shape: f32[8,16,8], index: 1, kind: input, shape index: {}]   ;;  %s2611_s2 = inlined_call_operand.vmem [shape: f32[8,8,8], index: 2, kind: output, shape index: {}]  }
   0x1   :  { %s1891_s11 = smov 0  }
   0x2 LB: > { %s24_s12 = sadd.s32 1, %s1849_s10  ;;  %p1541_p0 = scmp.ge.s32.totalorder %s1853_s11, 1  ;;  %s1853_s11 = sphi %s1891_s11, %s12_s11   ;;  %s1849_s10 = sphi %s1889_s10, %s2613_s10   ;;  %s1845_s9 = sphi %s1887_s9, %s2612_s9  }
   0x3   : > { %p26_p1 = scmp.ge.s32.totalorder %s24_s12, 2  ;;  %p144_p2 = scmp.lt.s32.totalorder %s1853_s11, 3 }
   0x5   : > { %s2615_s12 = smov (%p26_p1, %s24_s12), 0  ;;  %p145_p3 = pnand %p1541_p0, %p144_p2 }
   0x6   : > { %s1542_s13 = sshll.u32 (!%p145_p3), %s1845_s9, 2 }
   0x7   : > { %148 = sbr.rel (%p145_p3) target bundleno = 693 (0x2b5), region = 28  ;;  %p179_p4 = scmp.lt.s32.totalorder (!%p145_p3), %s1542_s13, 7 }
   0xc   : > { %s2617_s13 = smov (!%p179_p4, %s1542_s13), 7  ;;  %vm215_vm0 = vcmask 130048   ;;  %v1855_v28 = vmov 0   ;;  %vm312_vm10 = vcmask 64512  }
   0xd   : > { %s1543_s14 = sshll.u32 %s2617_s13, 3  ;;  %1595 = vset.pattern.permute.xlu2 %v1855_v28  ;;  %1593 = vset.pattern.permute.xlu0 %v1855_v28  ;;  %s1551_s18 = sshll.u32 %s2617_s13, 4 }
   0xe   : > { %s182_s17 = scalar_lea.vmem %s2609_s0, %s1543_s14  ;;  %1594 = vset.pattern.permute.xlu1 %v1855_v28  ;;  %s1943_s21 = scalar_lea.vmem %s2610_s1, %s1551_s18 }
   0xf   : > { %v205_v0 = vld [vmem:[%s182_s17 + $0x10] sm:$0xff]  ;;  %v203_v1 = vld [vmem:[%s182_s17] sm:$0xff]  ;;  %v206_v4 = vld [vmem:[%s182_s17 + $0x18] sm:$0xff]  ;;  %s2578_s24 = scalar_lea.vmem %s2611_s2, %s1543_s14 }
  0x10   : > { %v222_v2 = vsel %vm215_vm0, %v205_v0, -inf  ;;  %v216_v3 = vsel %vm215_vm0, %v203_v1, -inf  ;;  %v204_v5 = vld [vmem:[%s182_s17 + $0x8] sm:$0xff]  ;;  %v225_v6 = vsel %vm215_vm0, %v206_v4, -inf  ;;  %v211_v61 = vld [vmem:[%s1943_s21 + $0x20] sm:$0xff] }
  0x11   : > { %223 = vmax.xlane.f32.xlu1 %v222_v2  ;;  %217 = vmax.xlane.f32.xlu0 %v216_v3  ;;  %v219_v7 = vsel %vm215_vm0, %v204_v5, -inf  ;;  %v212_v62 = vld [vmem:[%s1943_s21 + $0x28] sm:$0xff] }
  0x12   : > { %v332_v2 = vsel %vm312_vm10, %v212_v62, -inf }
  0x19   : > { %226 = vmax.xlane.f32.xlu1 %v225_v6  ;;  %220 = vmax.xlane.f32.xlu0 %v219_v7 }
  0x84   : > { %v224_v8 = vpop.xlane.xlu1 %223  ;;  %v218_v9 = vpop.xlane.xlu0 %217 }
  0x85   : > { %v230_v10 = vsub.f32 %v205_v0, %v224_v8  ;;  %v228_v11 = vsub.f32 %v203_v1, %v218_v9  ;;  %v331_v1 = vsel %vm312_vm10, %v211_v61, -inf }
  0x87   : > { %v236_v12 = vmul.f32 1.442695, %v230_v10  ;;  %v232_v13 = vmul.f32 1.442695, %v228_v11 }
  0x89   : > { %1637 = vpow2.f32 %v236_v12 }
  0x8a   : > { %1639 = vpow2.f32 %v232_v13 }
  0x8c   : > { %v227_v14 = vpop.xlane.xlu1 %226  ;;  %v221_v15 = vpop.xlane.xlu0 %220 }
  0x8d   : > { %v231_v16 = vsub.f32 %v206_v4, %v227_v14  ;;  %v229_v17 = vsub.f32 %v204_v5, %v221_v15  ;;  %v333_v5 = vmax.f32 %v331_v1, %v332_v2 }
  0x8f   : > { %v1917_v18 = vpop.eup %1637  ;;  %v238_v19 = vmul.f32 1.442695, %v231_v16  ;;  %v234_v20 = vmul.f32 1.442695, %v229_v17  ;;  %v334_v10 = vrot.slane %v333_v5, 4 }
  0x90   : > { %v1919_v21 = vpop.eup %1639  ;;  %v246_v22 = vsel %vm215_vm0, %v1917_v18, 0.0 }
  0x91   : > { %1641 = vpow2.f32 %v238_v19  ;;  %247 = vadd.xlane.f32.xlu0 %v246_v22  ;;  %v240_v23 = vsel %vm215_vm0, %v1919_v21, 0.0  ;;  %v335_v14 = vmax.f32 %v333_v5, %v334_v10 }
  0x92   : > { %1643 = vpow2.f32 %v234_v20  ;;  %241 = vadd.xlane.f32.xlu2 %v240_v23  ;;  %v213_v20 = vld [vmem:[%s1943_s21 + $0x30] sm:$0xff] }
  0x93   : > { %v336_v19 = vrot.slane %v335_v14, 2  ;;  %v340_v23 = vsel %vm312_vm10, %v213_v20, -inf }
  0x97   : > { %v1925_v24 = vpop.eup %1641 }
  0x98   : > { %v1927_v25 = vpop.eup %1643  ;;  %v249_v26 = vsel %vm215_vm0, %v1925_v24, 0.0 }
  0x99   : > { %250 = vadd.xlane.f32.xlu1 %v249_v26  ;;  %v243_v27 = vsel %vm215_vm0, %v1927_v25, 0.0 }
  0x9a   : > { %244 = vadd.xlane.f32.xlu2 %v243_v27  ;;  %v337_v27 = vmax.f32 %v335_v14, %v336_v19 }
 0x104   : > { %v248_v29 = vpop.xlane.xlu0 %247 }
 0x105   : > { %v242_v30 = vpop.xlane.xlu2 %241  ;;  %1645 = vrcp.f32 %v248_v29  ;;  %v293_v36 = vand.u32 2147483648, %v248_v29  ;;  %v291_v42 = vand.u32 2147483647, %v248_v29  ;;  %vm287_vm1 = vweird.f32 %v248_v29 }
 0x106   : > { %1647 = vrcp.f32 %v242_v30  ;;  %v261_v40 = vand.u32 2147483647, %v242_v30  ;;  %v263_v41 = vand.u32 2147483648, %v242_v30  ;;  %vm257_vm4 = vweird.f32 %v242_v30 }
 0x107   : > { %v294_v45 = vor.u32 1.1754944e-38, %v293_v36  ;;  %vm292_vm7 = vcmp.eq.f32.partialorder %v291_v42, 8.507059e+37  ;;  %v210_v36 = vld [vmem:[%s1943_s21 + $0x18] sm:$0xff]  ;;  %v1857_v42 = vmov 3  }
 0x108   : > { %vm262_vm5 = vcmp.eq.f32.partialorder %v261_v40, 8.507059e+37  ;;  %v264_v49 = vor.u32 1.1754944e-38, %v263_v41  ;;  %v323_v41 = vsel %vm312_vm10, %v210_v36, -inf }
 0x10b   : > { %v1646_v31 = vpop.eup %1645 }
 0x10c   : > { %v1648_v32 = vpop.eup %1647  ;;  %v283_v33 = vmul.f32 %v1646_v31, %v248_v29  ;;  %v1933_v34 = vpop.xlane.xlu1 %250  ;;  %vm288_vm2 = vweird.f32 %v1646_v31  ;;  %v1856_v29 = vmov 1  }
 0x10d   : > { %v253_v35 = vmul.f32 %v1648_v32, %v242_v30  ;;  %1649 = vrcp.f32 %v1933_v34  ;;  %v1936_v37 = vpop.xlane.xlu2 %244  ;;  %vm258_vm3 = vweird.f32 %v1648_v32  ;;  %vm289_vm6 = vmor %vm287_vm1, %vm288_vm2  ;;  %vm302_vm9 = vweird.f32 %v1933_v34 }
 0x10e   : > { %v284_v38 = vsub.f32 1.0, %v283_v33  ;;  %1651 = vrcp.f32 %v1936_v37  ;;  %vm259_vm8 = vmor %vm257_vm4, %vm258_vm3  ;;  %v306_v53 = vand.u32 2147483647, %v1933_v34  ;;  %v308_v56 = vand.u32 2147483648, %v1933_v34 }
 0x10f   : > { %v254_v39 = vsub.f32 1.0, %v253_v35  ;;  %v278_v4 = vand.u32 2147483648, %v1936_v37  ;;  %v276_v8 = vand.u32 2147483647, %v1936_v37  ;;  %vm272_vm14 = vweird.f32 %v1936_v37  ;;  %v209_v35 = vld [vmem:[%s1943_s21 + $0x10] sm:$0xff] }
 0x110   : > { %v285_v43 = vmul.f32 %v1646_v31, %v284_v38  ;;  %v309_v6 = vor.u32 1.1754944e-38, %v308_v56  ;;  %vm307_vm15 = vcmp.eq.f32.partialorder %v306_v53, 8.507059e+37  ;;  %v322_v40 = vsel %vm312_vm10, %v209_v35, -inf }
 0x111   : > { %v255_v44 = vmul.f32 %v1648_v32, %v254_v39  ;;  %v279_v13 = vor.u32 1.1754944e-38, %v278_v4  ;;  %vm277_vm2 = vcmp.eq.f32.partialorder %v276_v8, 8.507059e+37 }
 0x112   : > { %v286_v46 = vadd.f32 %v1646_v31, %v285_v43 }
 0x113   : > { %v1650_v47 = vpop.eup %1649  ;;  %v256_v48 = vadd.f32 %v1648_v32, %v255_v44  ;;  %v324_v44 = vmax.f32 %v322_v40, %v323_v41  ;;  %v1861_v40 = vmov 6  }
 0x114   : > { %v1652_v50 = vpop.eup %1651  ;;  %v290_v51 = vsel %vm289_vm6, %v1646_v31, %v286_v46  ;;  %v298_v52 = vmul.f32 %v1650_v47, %v1933_v34  ;;  %vm303_vm11 = vweird.f32 %v1650_v47 }
 0x115   : > { %v260_v54 = vsel %vm259_vm8, %v1648_v32, %v256_v48  ;;  %v295_v55 = vsel %vm292_vm7, %v294_v45, %v290_v51  ;;  %v268_v57 = vmul.f32 %v1652_v50, %v1936_v37  ;;  %vm273_vm12 = vweird.f32 %v1652_v50  ;;  %vm304_vm13 = vmor %vm302_vm9, %vm303_vm11  ;;  %v208_v51 = vld [vmem:[%s1943_s21 + $0x8] sm:$0xff] }
 0x116   : > { %v265_v58 = vsel %vm262_vm5, %v264_v49, %v260_v54  ;;  %v1951_v59 = vmul.f32 %v1917_v18, %v295_v55  ;;  %v299_v60 = vsub.f32 1.0, %v298_v52  ;;  %vm274_vm1 = vmor %vm272_vm14, %vm273_vm12  ;;  %v325_v46 = vrot.slane %v324_v44, 4 }
 0x117   : > { %v1956_v63 = vmul.f32 %v1919_v21, %v265_v58  ;;  %v269_v0 = vsub.f32 1.0, %v268_v57  ;;  %v214_v21 = vld [vmem:[%s1943_s21 + $0x38] sm:$0xff]  ;;  %v314_v53 = vsel %vm312_vm10, %v208_v51, -inf }
 0x118   : > { %v300_v3 = vmul.f32 %v1650_v47, %v299_v60  ;;  %600 = vperm.xlu2 %1595, %v1951_v59   ;;  %v341_v26 = vsel %vm312_vm10, %v214_v21, -inf  ;;  %v326_v49 = vmax.f32 %v324_v44, %v325_v46 }
 0x119   : > { %v270_v7 = vmul.f32 %v1652_v50, %v269_v0  ;;  %590 = vperm.xlu0 %1593, %v1956_v63   ;;  %v342_v28 = vmax.f32 %v340_v23, %v341_v26  ;;  %v1860_v26 = vmov 5  }
 0x11a   : > { %v301_v9 = vadd.f32 %v1650_v47, %v300_v3  ;;  %v327_v57 = vrot.slane %v326_v49, 2  ;;  %v1859_v3 = vmov 4  }
 0x11b   : > { %v271_v11 = vadd.f32 %v1652_v50, %v270_v7  ;;  %v343_v30 = vrot.slane %v342_v28, 4 }
 0x11c   : > { %v305_v12 = vsel %vm304_vm13, %v1650_v47, %v301_v9  ;;  %v328_v1 = vmax.f32 %v326_v49, %v327_v57 }
 0x11d   : > { %v310_v15 = vsel %vm307_vm15, %v309_v6, %v305_v12  ;;  %v275_v16 = vsel %vm274_vm1, %v1652_v50, %v271_v11  ;;  %v344_v31 = vmax.f32 %v342_v28, %v343_v30  ;;  %v207_v50 = vld [vmem:[%s1943_s21] sm:$0xff] }
 0x11e   : > { %v1968_v17 = vmul.f32 %v1925_v24, %v310_v15  ;;  %v280_v18 = vsel %vm277_vm2, %v279_v13, %v275_v16  ;;  %v338_v24 = vrot.slane %v337_v27, 1  ;;  %v313_v52 = vsel %vm312_vm10, %v207_v50, -inf }
 0x11f   : > { %v1973_v22 = vmul.f32 %v1927_v25, %v280_v18  ;;  %v345_v34 = vrot.slane %v344_v31, 2  ;;  %v315_v58 = vmax.f32 %v313_v52, %v314_v53  ;;  %v329_v5 = vrot.slane %v328_v1, 1 }
 0x120   : > { %605 = vperm.xlu2 %1595, %v1968_v17   ;;  %v339_v25 = vmax.f32 %v337_v27, %v338_v24 }
 0x121   : > { %1598 = vset.pattern.permute.xlu0 %v1856_v29  ;;  %595 = vperm.xlu1 %1594, %v1973_v22   ;;  %v346_v39 = vmax.f32 %v344_v31, %v345_v34  ;;  %v316_v2 = vrot.slane %v315_v58, 4  ;;  %v330_v8 = vmax.f32 %v328_v1, %v329_v5  ;;  %v1863_v1 = vmov 9  }
 0x122   : > { %657 = vperm.xlu0 %1598, %v1968_v17   ;;  %v353_v32 = vsub.f32 %v211_v61, %v339_v25  ;;  %v354_v33 = vsub.f32 %v212_v62, %v339_v25  ;;  %v1858_v61 = vmov 2  }
 0x123   : > { %v347_v43 = vrot.slane %v346_v39, 1  ;;  %v317_v6 = vmax.f32 %v315_v58, %v316_v2  ;;  %v351_v12 = vsub.f32 %v209_v35, %v330_v8  ;;  %v352_v13 = vsub.f32 %v210_v36, %v330_v8 }
 0x124   : > { %v365_v37 = vmul.f32 1.442695, %v353_v32  ;;  %v367_v38 = vmul.f32 1.442695, %v354_v33 }
 0x125   : > { %v348_v45 = vmax.f32 %v346_v39, %v347_v43  ;;  %v318_v9 = vrot.slane %v317_v6, 2  ;;  %v361_v19 = vmul.f32 1.442695, %v351_v12 }
 0x126   : > { %1653 = vpow2.f32 %v365_v37 }
 0x127   : > { %1655 = vpow2.f32 %v367_v38  ;;  %v355_v47 = vsub.f32 %v213_v20, %v348_v45  ;;  %v356_v48 = vsub.f32 %v214_v21, %v348_v45  ;;  %v319_v14 = vmax.f32 %v317_v6, %v318_v9 }
 0x128   : > { %1597 = vset.pattern.permute.xlu2 %v1856_v29  ;;  %v363_v20 = vmul.f32 1.442695, %v352_v13  ;;  %v1864_v9 = vmov 10  }
 0x129   : > { %1596 = vset.pattern.permute.xlu1 %v1856_v29  ;;  %649 = vperm.xlu2 %1597, %v1973_v22   ;;  %v369_v55 = vmul.f32 1.442695, %v355_v47  ;;  %v371_v56 = vmul.f32 1.442695, %v356_v48  ;;  %v320_v21 = vrot.slane %v319_v14, 1 }
 0x12a   : > { %1601 = vset.pattern.permute.xlu0 %v1857_v42  ;;  %645 = vperm.xlu1 %1596, %v1956_v63  }
 0x12b   : > { %749 = vperm.xlu0 %1601, %v1956_v63   ;;  %1657 = vpow2.f32 %v369_v55  ;;  %v321_v28 = vmax.f32 %v319_v14, %v320_v21  ;;  %v1862_v55 = vmov 8  }
 0x12c   : > { %v1992_v54 = vpop.eup %1653  ;;  %1659 = vpow2.f32 %v371_v56 }
 0x12d   : > { %v1994_v60 = vpop.eup %1655  ;;  %v391_v62 = vsel %vm312_vm10, %v1992_v54, 0.0  ;;  %1661 = vpow2.f32 %v361_v19  ;;  %v349_v24 = vsub.f32 %v207_v50, %v321_v28  ;;  %v350_v30 = vsub.f32 %v208_v51, %v321_v28 }
 0x12e   : > { %v392_v0 = vsel %vm312_vm10, %v1994_v60, 0.0  ;;  %1663 = vpow2.f32 %v363_v20 }
 0x12f   : > { %v393_v4 = vadd.f32 %v392_v0, %v391_v62  ;;  %v357_v32 = vmul.f32 1.442695, %v349_v24  ;;  %v359_v33 = vmul.f32 1.442695, %v350_v30  ;;  %v1865_v24 = vmov 11  }
 0x131   : > { %1599 = vset.pattern.permute.xlu2 %v1858_v61  ;;  %v394_v7 = vrot.slane %v393_v4, 4  ;;  %v2004_v10 = vpop.eup %1657  ;;  %1665 = vpow2.f32 %v357_v32 }
 0x132   : > { %653 = vperm.xlu1 %1596, %v1951_v59   ;;  %697 = vperm.xlu2 %1599, %v1956_v63   ;;  %v2006_v15 = vpop.eup %1659  ;;  %v400_v16 = vsel %vm312_vm10, %v2004_v10, 0.0  ;;  %1667 = vpow2.f32 %v359_v33 }
 0x133   : > { %1605 = vset.pattern.permute.xlu0 %v1859_v3  ;;  %v395_v11 = vadd.f32 %v394_v7, %v393_v4  ;;  %v401_v18 = vsel %vm312_vm10, %v2006_v15, 0.0  ;;  %v2016_v34 = vpop.eup %1661 }
 0x134   : > { %805 = vperm.xlu0 %1605, %v1973_v22   ;;  %v402_v23 = vadd.f32 %v401_v18, %v400_v16  ;;  %v2019_v35 = vpop.eup %1663  ;;  %v382_v36 = vsel %vm312_vm10, %v2016_v34, 0.0 }
 0x135   : > { %v396_v27 = vrot.slane %v395_v11, 2  ;;  %v383_v39 = vsel %vm312_vm10, %v2019_v35, 0.0 }
 0x136   : > { %v403_v29 = vrot.slane %v402_v23, 4  ;;  %v384_v41 = vadd.f32 %v383_v39, %v382_v36 }
 0x137   : > { %v397_v25 = vadd.f32 %v396_v27, %v395_v11  ;;  %v2029_v44 = vpop.eup %1665 }
 0x138   : > { %v404_v31 = vadd.f32 %v403_v29, %v402_v23  ;;  %v385_v43 = vrot.slane %v384_v41, 4  ;;  %v2031_v47 = vpop.eup %1667  ;;  %v373_v49 = vsel %vm312_vm10, %v2029_v44, 0.0 }
 0x139   : > { %v398_v37 = vrot.slane %v397_v25, 1  ;;  %v374_v50 = vsel %vm312_vm10, %v2031_v47, 0.0 }
 0x13a   : > { %1600 = vset.pattern.permute.xlu1 %v1858_v61  ;;  %705 = vperm.xlu2 %1599, %v1951_v59   ;;  %v405_v38 = vrot.slane %v404_v31, 2  ;;  %v386_v48 = vadd.f32 %v385_v43, %v384_v41  ;;  %v375_v52 = vadd.f32 %v374_v50, %v373_v49  ;;  %v1866_v43 = vmov 13  }
 0x13b   : > { %701 = vperm.xlu1 %1600, %v1973_v22   ;;  %v399_v45 = vadd.f32 %v398_v37, %v397_v25 }
 0x13c   : > { %1609 = vset.pattern.permute.xlu0 %v1860_v26  ;;  %v406_v46 = vadd.f32 %v405_v38, %v404_v31  ;;  %v387_v53 = vrot.slane %v386_v48, 2  ;;  %v376_v57 = vrot.slane %v375_v52, 4 }
 0x13d   : > { %861 = vperm.xlu0 %1609, %v1951_v59   ;;  %1669 = vrcp.f32 %v399_v45  ;;  %vm446_vm3 = vweird.f32 %v399_v45  ;;  %v452_v11 = vand.u32 2147483648, %v399_v45  ;;  %v450_v14 = vand.u32 2147483647, %v399_v45 }
 0x13e   : > { %v407_v51 = vrot.slane %v406_v46, 1  ;;  %v388_v58 = vadd.f32 %v387_v53, %v386_v48 }
 0x13f   : > { %v453_v19 = vor.u32 1.1754944e-38, %v452_v11  ;;  %vm451_vm6 = vcmp.eq.f32.partialorder %v450_v14, 8.507059e+37 }
 0x140   : > { %v2042_v56 = vadd.f32 %v407_v51, %v406_v46  ;;  %v389_v0 = vrot.slane %v388_v58, 1 }
 0x142   : > { %1602 = vset.pattern.permute.xlu2 %v1857_v42  ;;  %1671 = vrcp.f32 %v2042_v56  ;;  %v2051_v5 = vadd.f32 %v389_v0, %v388_v58  ;;  %vm462_vm7 = vweird.f32 %v2042_v56  ;;  %v468_v29 = vand.u32 2147483648, %v2042_v56 }
 0x143   : > { %709 = vperm.xlu1 %1600, %v1968_v17   ;;  %753 = vperm.xlu2 %1602, %v1973_v22   ;;  %v1670_v61 = vpop.eup %1669  ;;  %v466_v30 = vand.u32 2147483647, %v2042_v56 }
 0x144   : > { %v442_v62 = vmul.f32 %v1670_v61, %v399_v45  ;;  %1673 = vrcp.f32 %v2051_v5  ;;  %vm447_vm4 = vweird.f32 %v1670_v61  ;;  %v469_v32 = vor.u32 1.1754944e-38, %v468_v29 }
 0x145   : > { %1612 = vset.pattern.permute.xlu0 %v1861_v40  ;;  %vm448_vm5 = vmor %vm446_vm3, %vm447_vm4  ;;  %vm467_vm11 = vcmp.eq.f32.partialorder %v466_v30, 8.507059e+37  ;;  %vm430_vm12 = vweird.f32 %v2051_v5  ;;  %v434_v46 = vand.u32 2147483647, %v2051_v5 }
 0x146   : > { %917 = vperm.xlu0 %1612, %v1968_v17   ;;  %v443_v4 = vsub.f32 1.0, %v442_v62 }
 0x147   : > { %vm435_vm15 = vcmp.eq.f32.partialorder %v434_v46, 8.507059e+37 }
 0x148   : > { %v1672_v6 = vpop.eup %1671  ;;  %v444_v7 = vmul.f32 %v1670_v61, %v443_v4 }
 0x149   : > { %v458_v8 = vmul.f32 %v1672_v6, %v2042_v56  ;;  %vm463_vm8 = vweird.f32 %v1672_v6 }
 0x14a   : > { %v445_v13 = vadd.f32 %v1670_v61, %v444_v7  ;;  %v1674_v18 = vpop.eup %1673  ;;  %vm464_vm9 = vmor %vm462_vm7, %vm463_vm8  ;;  %v1869_v7 = vmov 0.6931472  }
 0x14b   : > { %1603 = vset.pattern.permute.xlu1 %v1857_v42  ;;  %761 = vperm.xlu2 %1602, %v1968_v17   ;;  %v377_v42 = vadd.f32 %v376_v57, %v375_v52  ;;  %v459_v16 = vsub.f32 1.0, %v458_v8  ;;  %v426_v27 = vmul.f32 %v1674_v18, %v2051_v5  ;;  %vm431_vm13 = vweird.f32 %v1674_v18 }
 0x14c   : > { %757 = vperm.xlu1 %1603, %v1951_v59   ;;  %v449_v21 = vsel %vm448_vm5, %v1670_v61, %v445_v13  ;;  %vm432_vm14 = vmor %vm430_vm12, %vm431_vm13  ;;  %v1867_v52 = vmov 7  }
 0x14d   : > { %v378_v2 = vrot.slane %v377_v42, 2  ;;  %v460_v23 = vmul.f32 %v1672_v6, %v459_v16  ;;  %v2067_v28 = vsel %vm451_vm6, %v453_v19, %v449_v21  ;;  %v427_v25 = vsub.f32 1.0, %v426_v27 }
 0x14e   : > { %1615 = vset.pattern.permute.xlu0 %v1862_v55  ;;  %v2076_v31 = vmul.f32 %v1992_v54, %v2067_v28  ;;  %v436_v54 = vand.u32 2147483648, %v2051_v5 }
 0x14f   : > { %1009 = vperm.xlu0 %1615, %v1956_v63   ;;  %v428_v37 = vmul.f32 %v1674_v18, %v427_v25 }
 0x150   : > { %v610_v38 = vperm.slane %v2076_v31, 0  ;;  %v437_v50 = vor.u32 1.1754944e-38, %v436_v54 }
 0x151   : > { %v429_v45 = vadd.f32 %v1674_v18, %v428_v37 }
 0x153   : > { %1606 = vset.pattern.permute.xlu2 %v1859_v3  ;;  %v433_v53 = vsel %vm432_vm14, %v1674_v18, %v429_v45 }
 0x154   : > { %1604 = vset.pattern.permute.xlu1 %v1859_v3  ;;  %809 = vperm.xlu2 %1606, %v1951_v59   ;;  %v379_v3 = vadd.f32 %v378_v2, %v377_v42  ;;  %v2100_v57 = vsel %vm435_vm15, %v437_v50, %v433_v53  ;;  %v1868_v42 = vmov 14  }
 0x155   : > { %801 = vperm.xlu1 %1604, %v1956_v63   ;;  %v2107_v62 = vmul.f32 %v2016_v34, %v2100_v57 }
 0x156   : > { %v380_v12 = vrot.slane %v379_v3, 1 }
 0x157   : > { %1619 = vset.pattern.permute.xlu0 %v1863_v1  ;;  %v661_v5 = vperm.slane %v2107_v62, 1  ;;  %v609_v25 = vperm.slane %v2107_v62, 0 }
 0x158   : > { %1065 = vperm.xlu0 %1619, %v1973_v22   ;;  %v2060_v20 = vadd.f32 %v380_v12, %v379_v3 }
 0x15a   : > { %1675 = vrcp.f32 %v2060_v20  ;;  %vm414_vm1 = vweird.f32 %v2060_v20  ;;  %v420_v0 = vand.u32 2147483648, %v2060_v20  ;;  %v418_v4 = vand.u32 2147483647, %v2060_v20 }
 0x15b   : > { %1677 = vrcp.f32 %v1869_v7  ;;  %v765_v7 = vperm.slane %v2107_v62, 3 }
 0x15c   : > { %1607 = vset.pattern.permute.xlu2 %v1860_v26  ;;  %vm419_vm4 = vcmp.eq.f32.partialorder %v418_v4, 8.507059e+37 }
 0x15d   : > { %813 = vperm.xlu1 %1604, %v1968_v17   ;;  %853 = vperm.xlu2 %1607, %v1956_v63  }
 0x160   : > { %1623 = vset.pattern.permute.xlu0 %v1864_v9  ;;  %v1676_v36 = vpop.eup %1675 }
 0x161   : > { %1121 = vperm.xlu0 %1623, %v1951_v59   ;;  %v410_v41 = vmul.f32 %v1676_v36, %v2060_v20  ;;  %vm415_vm2 = vweird.f32 %v1676_v36  ;;  %v1678_v13 = vpop.eup %1677  ;;  %v474_v20 = vadd.f32 1e-06, %v1973_v22 }
 0x162   : > { %vm416_vm3 = vmor %vm414_vm1, %vm415_vm2  ;;  %v486_v16 = vmul.f32 0.6931472, %v1678_v13  ;;  %vm490_vm5 = vweird.f32 %v1678_v13 }
 0x163   : > { %v411_v51 = vsub.f32 1.0, %v410_v41  ;;  %1679 = vlog2.f32 %v474_v20 }
 0x164   : > { %v487_v29 = vsub.f32 1.0, %v486_v16 }
 0x165   : > { %1608 = vset.pattern.permute.xlu1 %v1860_v26  ;;  %865 = vperm.xlu2 %1607, %v1968_v17   ;;  %v461_v26 = vadd.f32 %v1672_v6, %v460_v23  ;;  %v412_v58 = vmul.f32 %v1676_v36, %v411_v51 }
 0x166   : > { %857 = vperm.xlu1 %1608, %v1973_v22   ;;  %v488_v37 = vmul.f32 %v1678_v13, %v487_v29 }
 0x167   : > { %v465_v33 = vsel %vm464_vm9, %v1672_v6, %v461_v26  ;;  %v413_v2 = vadd.f32 %v1676_v36, %v412_v58  ;;  %v421_v6 = vor.u32 1.1754944e-38, %v420_v0 }
 0x168   : > { %v2083_v39 = vsel %vm467_vm11, %v469_v32, %v465_v33  ;;  %v489_v53 = vadd.f32 %v1678_v13, %v488_v37 }
 0x169   : > { %1626 = vset.pattern.permute.xlu0 %v1865_v24  ;;  %v2095_v49 = vmul.f32 %v2004_v10, %v2083_v39  ;;  %v417_v3 = vsel %vm416_vm3, %v1676_v36, %v413_v2  ;;  %v714_v36 = vperm.slane %v2076_v31, 2  ;;  %v1680_v45 = vpop.eup %1679 }
 0x16a   : > { %1177 = vperm.xlu0 %1626, %v1968_v17   ;;  %v2114_v11 = vsel %vm419_vm4, %v421_v6, %v417_v3 }
 0x16b   : > { %v611_v56 = vperm.slane %v2095_v49, 0  ;;  %v2119_v12 = vmul.f32 %v2029_v44, %v2114_v11  ;;  %v663_v33 = vperm.slane %v2095_v49, 1  ;;  %v767_v37 = vperm.slane %v2095_v49, 3 }
 0x16d   : > { %1611 = vset.pattern.permute.xlu2 %v1861_v40  ;;  %v712_v14 = vperm.slane %v2119_v12, 2  ;;  %v608_v27 = vperm.slane %v2119_v12, 0  ;;  %v764_v6 = vperm.slane %v2119_v12, 3 }
 0x16e   : > { %1610 = vset.pattern.permute.xlu1 %v1861_v40  ;;  %909 = vperm.xlu2 %1611, %v1973_v22  }
 0x16f   : > { %905 = vperm.xlu1 %1610, %v1956_v63  }
 0x172   : > { %1629 = vset.pattern.permute.xlu0 %v1866_v43  ;;  %v601_v40 = vpop.permute.xlu2 %600 }
 0x173   : > { %1269 = vperm.xlu0 %1629, %v1956_v63   ;;  %v2091_v48 = vadd.f32 %v610_v38, %v601_v40 }
 0x175   : > { %v2147_v58 = vmul.f32 0.5, %v2091_v48 }
 0x176   : > { %1613 = vset.pattern.permute.xlu2 %v1867_v52 }
 0x177   : > { %913 = vperm.xlu1 %1610, %v1951_v59   ;;  %957 = vperm.xlu2 %1613, %v1956_v63  }
 0x17a   : > { %v606_v61 = vpop.permute.xlu2 %605 }
 0x17b   : > { %1633 = vset.pattern.permute.xlu0 %v1868_v42  ;;  %v615_v10 = vadd.f32 %v611_v56, %v606_v61 }
 0x17c   : > { %1325 = vperm.xlu0 %1633, %v1973_v22  }
 0x17d   : > { %v2124_v18 = vmul.f32 0.5, %v615_v10  ;;  %v480_v10 = vmul.f32 0.6931472, %v1680_v45 }
 0x17f   : > { %1614 = vset.pattern.permute.xlu1 %v1867_v52  ;;  %965 = vperm.xlu2 %1613, %v1951_v59   ;;  %v623_v26 = vadd.f32 1e-06, %v2124_v18 }
 0x180   : > { %961 = vperm.xlu1 %1614, %v1973_v22  }
 0x181   : > { %1681 = vlog2.f32 %v623_v26 }
 0x183   : > { %v650_v34 = vpop.permute.xlu2 %649 }
 0x184   : > { %v665_v8 = vadd.f32 %v661_v5, %v650_v34  ;;  %v660_v5 = vperm.slane %v2119_v12, 1  ;;  %v2161_v34 = vsel %vm490_vm5, %v1678_v13, %v489_v53 }
 0x185   : > { %v493_v16 = vmul.f32 %v2161_v34, %v480_v10 }
 0x186   : > { %v2127_v21 = vmul.f32 0.5, %v665_v8  ;;  %v1870_v8 = vmov 15  }
 0x187   : > { %1616 = vset.pattern.permute.xlu2 %v1862_v55  ;;  %v1682_v0 = vpop.eup %1681  ;;  %1635 = vset.pattern.permute.xlu0 %v1870_v8 }
 0x188   : > { %969 = vperm.xlu1 %1614, %v1968_v17   ;;  %1013 = vperm.xlu2 %1616, %v1973_v22   ;;  %v673_v30 = vadd.f32 1e-06, %v2127_v21 }
 0x18a   : > { %1683 = vlog2.f32 %v673_v30 }
 0x18b   : > { %v591_v19 = vpop.permute.xlu0 %590 }
 0x18c   : > { %v698_v23 = vpop.permute.xlu2 %697  ;;  %v612_v32 = vadd.f32 %v608_v27, %v591_v19  ;;  %v631_v19 = vmul.f32 0.6931472, %v1682_v0  ;;  %v817_v0 = vperm.slane %v2107_v62, 4 }
 0x18d   : > { %v716_v44 = vadd.f32 %v712_v14, %v698_v23 }
 0x18f   : > { %v2140_v51 = vmul.f32 0.5, %v716_v44 }
 0x190   : > { %1617 = vset.pattern.permute.xlu1 %v1862_v55  ;;  %1021 = vperm.xlu2 %1616, %v1968_v17   ;;  %v2138_v55 = vmul.f32 0.5, %v612_v32  ;;  %v1684_v48 = vpop.eup %1683 }
 0x191   : > { %1017 = vperm.xlu1 %1617, %v1951_v59   ;;  %v724_v3 = vadd.f32 1e-06, %v2140_v51  ;;  %v679_v20 = vmul.f32 0.6931472, %v1684_v48 }
 0x192   : > { %v620_v2 = vadd.f32 1e-06, %v2138_v55 }
 0x193   : > { %v596_v38 = vpop.permute.xlu1 %595 }
 0x194   : > { %v613_v54 = vadd.f32 %v609_v25, %v596_v38  ;;  %v658_v41 = vpop.permute.xlu0 %657  ;;  %v706_v40 = vpop.permute.xlu2 %705 }
 0x195   : > { %v667_v46 = vadd.f32 %v663_v33, %v658_v41  ;;  %v718_v50 = vadd.f32 %v714_v36, %v706_v40  ;;  %v662_v33 = vperm.slane %v2076_v31, 1  ;;  %v497_v36 = vmul.f32 %v493_v16, %v1973_v22 }
 0x196   : > { %v2142_v52 = vmul.f32 0.5, %v613_v54  ;;  %v635_v54 = vmul.f32 %v631_v19, %v2161_v34  ;;  %v685_v41 = vmul.f32 %v679_v20, %v2161_v34 }
 0x197   : > { %v2144_v56 = vmul.f32 0.5, %v667_v46  ;;  %v2166_v29 = vmul.f32 0.5, %v718_v50 }
 0x198   : > { %v621_v61 = vadd.f32 1e-06, %v2142_v52  ;;  %1620 = vset.pattern.permute.xlu2 %v1863_v1  ;;  %v639_v48 = vmul.f32 %v635_v54, %v2124_v18 }
 0x199   : > { %v675_v4 = vadd.f32 1e-06, %v2144_v56  ;;  %1618 = vset.pattern.permute.xlu1 %v1863_v1  ;;  %1069 = vperm.xlu2 %1620, %v1951_v59   ;;  %v622_v1 = vadd.f32 1e-06, %v2147_v58  ;;  %v726_v50 = vadd.f32 1e-06, %v2166_v29 }
 0x19a   : > { %1685 = vlog2.f32 %v621_v61  ;;  %1061 = vperm.xlu1 %1618, %v1956_v63  }
 0x19b   : > { %1687 = vlog2.f32 %v675_v4 }
 0x19c   : > { %v646_v14 = vpop.permute.xlu1 %645  ;;  %1689 = vlog2.f32 %v620_v2 }
 0x19d   : > { %v664_v23 = vadd.f32 %v660_v5, %v646_v14  ;;  %v750_v27 = vpop.permute.xlu0 %749  ;;  %v754_v44 = vpop.permute.xlu2 %753  ;;  %1691 = vlog2.f32 %v724_v3  ;;  %v689_v3 = vmul.f32 %v685_v41, %v2127_v21 }
 0x19e   : > { %v768_v13 = vadd.f32 %v764_v6, %v750_v27  ;;  %v769_v26 = vadd.f32 %v765_v7, %v754_v44  ;;  %1693 = vlog2.f32 %v622_v1  ;;  %v503_v6 = vsel %vm215_vm0, %v497_v36, 0.0 }
 0x19f   : > { %v2168_v30 = vmul.f32 0.5, %v664_v23 }
 0x1a0   : > { %v1686_v25 = vpop.eup %1685  ;;  %v2170_v32 = vmul.f32 0.5, %v768_v13  ;;  %v2195_v21 = vmul.f32 0.5, %v769_v26  ;;  %v818_v26 = vperm.slane %v2076_v31, 4 }
 0x1a1   : > { %v1688_v38 = vpop.eup %1687  ;;  %v627_v40 = vmul.f32 0.6931472, %v1686_v25  ;;  %v672_v45 = vadd.f32 1e-06, %v2168_v30  ;;  %1621 = vset.pattern.permute.xlu2 %v1864_v9 }
 0x1a2   : > { %v683_v46 = vmul.f32 0.6931472, %v1688_v38  ;;  %v776_v53 = vadd.f32 1e-06, %v2170_v32  ;;  %1073 = vperm.xlu1 %1618, %v1968_v17   ;;  %1113 = vperm.xlu2 %1621, %v1956_v63   ;;  %v1690_v61 = vpop.eup %1689 }
 0x1a3   : > { %v633_v10 = vmul.f32 %v627_v40, %v2161_v34  ;;  %1695 = vlog2.f32 %v672_v45  ;;  %v1692_v2 = vpop.eup %1691  ;;  %v625_v16 = vmul.f32 0.6931472, %v1690_v61  ;;  %v870_v61 = vperm.slane %v2076_v31, 5 }
 0x1a4   : > { %v687_v4 = vmul.f32 %v683_v46, %v2161_v34  ;;  %1697 = vlog2.f32 %v776_v53  ;;  %v654_v5 = vpop.permute.xlu1 %653  ;;  %v729_v27 = vmul.f32 0.6931472, %v1692_v2  ;;  %v1694_v36 = vpop.eup %1693  ;;  %v777_v53 = vadd.f32 1e-06, %v2195_v21 }
 0x1a5   : > { %v637_v7 = vmul.f32 %v633_v10, %v2142_v52  ;;  %v666_v1 = vadd.f32 %v662_v33, %v654_v5  ;;  %v762_v14 = vpop.permute.xlu2 %761  ;;  %1699 = vlog2.f32 %v726_v50 }
 0x1a6   : > { %v691_v19 = vmul.f32 %v687_v4, %v2144_v56  ;;  %504 = vadd.xlane.f32.xlu0 %v503_v6  ;;  %v771_v20 = vadd.f32 %v767_v37, %v762_v14  ;;  %v806_v23 = vpop.permute.xlu0 %805  ;;  %v632_v56 = vmul.f32 %v625_v16, %v2161_v34  ;;  %v713_v37 = vperm.slane %v2107_v62, 2 }
 0x1a7   : > { %v2191_v44 = vadd.f32 %v689_v3, %v637_v7  ;;  %v670_v13 = vmul.f32 0.5, %v666_v1  ;;  %v821_v25 = vadd.f32 %v817_v0, %v806_v23  ;;  %v736_v40 = vmul.f32 %v729_v27, %v2161_v34 }
 0x1a8   : > { %v2193_v18 = vadd.f32 %v691_v19, %v639_v48  ;;  %v636_v2 = vmul.f32 %v632_v56, %v2138_v55  ;;  %v2214_v1 = vmul.f32 0.5, %v771_v20 }
 0x1a9   : > { %v1696_v52 = vpop.eup %1695  ;;  %v674_v33 = vadd.f32 1e-06, %v670_v13  ;;  %v2197_v38 = vmul.f32 0.5, %v821_v25  ;;  %v740_v3 = vmul.f32 %v736_v40, %v2140_v51  ;;  %v923_v40 = vperm.slane %v2095_v49, 6 }
 0x1aa   : > { %v1698_v54 = vpop.eup %1697  ;;  %v677_v41 = vmul.f32 0.6931472, %v1696_v52  ;;  %1622 = vset.pattern.permute.xlu1 %v1864_v9  ;;  %1125 = vperm.xlu2 %1621, %v1968_v17   ;;  %v629_v9 = vmul.f32 0.6931472, %v1694_v36 }
 0x1ab   : > { %v781_v45 = vmul.f32 0.6931472, %v1698_v54  ;;  %1701 = vlog2.f32 %v674_v33  ;;  %1117 = vperm.xlu1 %1622, %v1973_v22   ;;  %v1700_v46 = vpop.eup %1699  ;;  %v829_v10 = vadd.f32 1e-06, %v2197_v38  ;;  %v779_v54 = vadd.f32 1e-06, %v2214_v1 }
 0x1ac   : > { %v684_v50 = vmul.f32 %v677_v41, %v2161_v34  ;;  %v733_v7 = vmul.f32 0.6931472, %v1700_v46  ;;  %1703 = vlog2.f32 %v777_v53  ;;  %v634_v55 = vmul.f32 %v629_v9, %v2161_v34 }
 0x1ad   : > { %v702_v0 = vpop.permute.xlu1 %701  ;;  %v788_v5 = vmul.f32 %v781_v45, %v2161_v34  ;;  %1705 = vlog2.f32 %v829_v10 }
 0x1ae   : > { %v688_v4 = vmul.f32 %v684_v50, %v2168_v30  ;;  %v717_v6 = vadd.f32 %v713_v37, %v702_v0  ;;  %v810_v48 = vpop.permute.xlu2 %809  ;;  %v715_v30 = vperm.slane %v2095_v49, 2  ;;  %v738_v20 = vmul.f32 %v733_v7, %v2161_v34 }
 0x1af   : > { %v822_v14 = vadd.f32 %v818_v26, %v810_v48  ;;  %v862_v16 = vpop.permute.xlu0 %861  ;;  %v792_v52 = vmul.f32 %v788_v5, %v2170_v32  ;;  %v868_v32 = vperm.slane %v2119_v12, 5  ;;  %v638_v26 = vmul.f32 %v634_v55, %v2147_v58 }
 0x1b0   : > { %v692_v19 = vadd.f32 %v688_v4, %v636_v2  ;;  %v721_v23 = vmul.f32 0.5, %v717_v6  ;;  %v874_v27 = vadd.f32 %v870_v61, %v862_v16  ;;  %v742_v53 = vmul.f32 %v738_v20, %v2166_v29 }
 0x1b1   : > { %v1702_v25 = vpop.eup %1701  ;;  %v2232_v10 = vmul.f32 0.5, %v822_v14  ;;  %v1871_v29 = vmov 12   ;;  %v766_v16 = vperm.slane %v2076_v31, 3 }
 0x1b2   : > { %v744_v36 = vadd.f32 %v740_v3, %v692_v19  ;;  %v681_v33 = vmul.f32 0.6931472, %v1702_v25  ;;  %v725_v51 = vadd.f32 1e-06, %v721_v23  ;;  %1625 = vset.pattern.permute.xlu2 %v1865_v24  ;;  %v1704_v45 = vpop.eup %1703  ;;  %v2241_v19 = vmul.f32 0.5, %v874_v27 }
 0x1b3   : > { %1624 = vset.pattern.permute.xlu1 %v1865_v24  ;;  %1169 = vperm.xlu2 %1625, %v1973_v22   ;;  %v1706_v24 = vpop.eup %1705  ;;  %v783_v5 = vmul.f32 0.6931472, %v1704_v45  ;;  %v830_v14 = vadd.f32 1e-06, %v2232_v10  ;;  %v871_v25 = vperm.slane %v2095_v49, 5 }
 0x1b4   : > { %v2224_v56 = vadd.f32 %v792_v52, %v744_v36  ;;  %v686_v41 = vmul.f32 %v681_v33, %v2161_v34  ;;  %1707 = vlog2.f32 %v725_v51  ;;  %1165 = vperm.xlu1 %1624, %v1956_v63   ;;  %v882_v27 = vadd.f32 1e-06, %v2241_v19 }
 0x1b5   : > { %v710_v37 = vpop.permute.xlu1 %709  ;;  %1709 = vlog2.f32 %v779_v54 }
 0x1b6   : > { %v690_v46 = vmul.f32 %v686_v41, %v670_v13  ;;  %v719_v50 = vadd.f32 %v715_v30, %v710_v37  ;;  %v835_v13 = vmul.f32 0.6931472, %v1706_v24  ;;  %v789_v30 = vmul.f32 %v783_v5, %v2161_v34 }
 0x1b7   : > { %v854_v61 = vpop.permute.xlu2 %853 }
 0x1b8   : > { %v694_v9 = vadd.f32 %v690_v46, %v638_v26  ;;  %v723_v0 = vmul.f32 0.5, %v719_v50  ;;  %v872_v2 = vadd.f32 %v868_v32, %v854_v61  ;;  %v918_v4 = vpop.permute.xlu0 %917  ;;  %v841_v33 = vmul.f32 %v835_v13, %v2161_v34 }
 0x1b9   : > { %v2234_v6 = vadd.f32 %v923_v40, %v918_v4  ;;  %v793_v37 = vmul.f32 %v789_v30, %v2195_v21  ;;  %v921_v21 = vperm.slane %v2107_v62, 6 }
 0x1ba   : > { %v1708_v48 = vpop.eup %1707  ;;  %v727_v3 = vadd.f32 1e-06, %v723_v0  ;;  %1381 = vperm.xlu0 %1635, %v1951_v59   ;;  %v2237_v58 = vadd.f32 %v742_v53, %v694_v9  ;;  %v2250_v41 = vmul.f32 0.5, %v872_v2  ;;  %v845_v50 = vmul.f32 %v841_v33, %v2197_v38 }
 0x1bb   : > { %v731_v7 = vmul.f32 0.6931472, %v1708_v48  ;;  %1627 = vset.pattern.permute.xlu2 %v1871_v29  ;;  %v1710_v55 = vpop.eup %1709  ;;  %v816_v9 = vperm.slane %v2119_v12, 4  ;;  %v2271_v33 = vmul.f32 0.5, %v2234_v6  ;;  %v972_v6 = vperm.slane %v2119_v12, 7 }
 0x1bc   : > { %1711 = vlog2.f32 %v727_v3  ;;  %1173 = vperm.xlu1 %1624, %v1951_v59   ;;  %1217 = vperm.xlu2 %1627, %v1956_v63   ;;  %v787_v40 = vmul.f32 0.6931472, %v1710_v55  ;;  %v880_v61 = vadd.f32 1e-06, %v2250_v41 }
 0x1bd   : > { %v737_v36 = vmul.f32 %v731_v7, %v2161_v34  ;;  %1713 = vlog2.f32 %v830_v14 }
 0x1be   : > { %v758_v52 = vpop.permute.xlu1 %757  ;;  %1715 = vlog2.f32 %v882_v27  ;;  %v791_v2 = vmul.f32 %v787_v40, %v2161_v34  ;;  %v935_v40 = vadd.f32 1e-06, %v2271_v33 }
 0x1bf   : > { %v741_v51 = vmul.f32 %v737_v36, %v721_v23  ;;  %v770_v20 = vadd.f32 %v766_v16, %v758_v52  ;;  %v866_v54 = vpop.permute.xlu2 %865 }
 0x1c0   : > { %v875_v32 = vadd.f32 %v871_v25, %v866_v54  ;;  %v795_v7 = vmul.f32 %v791_v2, %v2214_v1  ;;  %v819_v1 = vperm.slane %v2095_v49, 4 }
 0x1c1   : > { %v745_v45 = vadd.f32 %v741_v51, %v2191_v44  ;;  %v774_v26 = vmul.f32 0.5, %v770_v20 }
 0x1c2   : > { %v1712_v46 = vpop.eup %1711  ;;  %v2266_v55 = vmul.f32 0.5, %v875_v32 }
 0x1c3   : > { %v797_v24 = vadd.f32 %v793_v37, %v745_v45  ;;  %v735_v53 = vmul.f32 0.6931472, %v1712_v46  ;;  %v778_v23 = vadd.f32 1e-06, %v774_v26  ;;  %v1714_v4 = vpop.eup %1713 }
 0x1c4   : > { %1628 = vset.pattern.permute.xlu1 %v1871_v29  ;;  %1225 = vperm.xlu2 %1627, %v1951_v59   ;;  %v837_v29 = vmul.f32 0.6931472, %v1714_v4  ;;  %v1716_v25 = vpop.eup %1715  ;;  %v883_v32 = vadd.f32 1e-06, %v2266_v55 }
 0x1c5   : > { %v739_v44 = vmul.f32 %v735_v53, %v2161_v34  ;;  %1717 = vlog2.f32 %v778_v23  ;;  %1221 = vperm.xlu1 %1628, %v1973_v22   ;;  %v2262_v38 = vadd.f32 %v845_v50, %v797_v24  ;;  %v2286_v23 = vmul.f32 %v2031_v47, %v2114_v11 }
 0x1c6   : > { %1719 = vlog2.f32 %v880_v61  ;;  %v842_v20 = vmul.f32 %v837_v29, %v2161_v34  ;;  %v869_v47 = vperm.slane %v2107_v62, 5 }
 0x1c7   : > { %v743_v5 = vmul.f32 %v739_v44, %v723_v0  ;;  %v802_v48 = vpop.permute.xlu1 %801 }
 0x1c8   : > { %v820_v3 = vadd.f32 %v816_v9, %v802_v48  ;;  %v910_v13 = vpop.permute.xlu2 %909  ;;  %v846_v50 = vmul.f32 %v842_v20, %v2232_v10 }
 0x1c9   : > { %v747_v16 = vadd.f32 %v743_v5, %v2193_v18  ;;  %v925_v14 = vadd.f32 %v921_v21, %v910_v13  ;;  %v889_v18 = vmul.f32 0.6931472, %v1716_v25  ;;  %v1010_v13 = vpop.permute.xlu0 %1009 }
 0x1ca   : > { %v824_v30 = vmul.f32 0.5, %v820_v3  ;;  %v974_v3 = vperm.slane %v2076_v31, 7 }
 0x1cb   : > { %v1718_v36 = vpop.eup %1717  ;;  %v2268_v52 = vadd.f32 %v795_v7, %v747_v16  ;;  %v894_v24 = vmul.f32 %v889_v18, %v2161_v34  ;;  %v2289_v44 = vmul.f32 0.5, %v925_v14 }
 0x1cc   : > { %v785_v0 = vmul.f32 0.6931472, %v1718_v36  ;;  %v828_v51 = vadd.f32 1e-06, %v824_v30  ;;  %1630 = vset.pattern.permute.xlu2 %v1866_v43  ;;  %v1720_v54 = vpop.eup %1719 }
 0x1cd   : > { %1229 = vperm.xlu1 %1628, %v1968_v17   ;;  %1273 = vperm.xlu2 %1630, %v1973_v22   ;;  %v885_v53 = vmul.f32 0.6931472, %v1720_v54  ;;  %v898_v10 = vmul.f32 %v894_v24, %v2241_v19 }
 0x1ce   : > { %v790_v27 = vmul.f32 %v785_v0, %v2161_v34  ;;  %1721 = vlog2.f32 %v828_v51 }
 0x1cf   : > { %v814_v37 = vpop.permute.xlu1 %813  ;;  %1723 = vlog2.f32 %v883_v32  ;;  %v892_v11 = vmul.f32 %v885_v53, %v2161_v34 }
 0x1d0   : > { %v794_v45 = vmul.f32 %v790_v27, %v774_v26  ;;  %v823_v46 = vadd.f32 %v819_v1, %v814_v37  ;;  %1725 = vlog2.f32 %v935_v40 }
 0x1d1   : > { %v958_v61 = vpop.permute.xlu2 %957  ;;  %v896_v0 = vmul.f32 %v892_v11, %v2250_v41  ;;  %v2314_v41 = vmul.f32 %v2019_v35, %v2100_v57 }
 0x1d2   : > { %v798_v9 = vadd.f32 %v794_v45, %v2237_v58  ;;  %v827_v21 = vmul.f32 0.5, %v823_v46  ;;  %v976_v2 = vadd.f32 %v972_v6, %v958_v61  ;;  %v1024_v58 = vperm.slane %v2286_v23, 0 }
 0x1d3   : > { %v1025_v53 = vperm.slane %v2314_v41, 0 }
 0x1d4   : > { %v1722_v4 = vpop.eup %1721  ;;  %v850_v26 = vadd.f32 %v846_v50, %v798_v9  ;;  %v831_v5 = vadd.f32 1e-06, %v827_v21  ;;  %v1028_v51 = vadd.f32 %v1024_v58, %v1010_v13  ;;  %v2306_v32 = vmul.f32 0.5, %v976_v2 }
 0x1d5   : > { %v833_v48 = vmul.f32 0.6931472, %v1722_v4  ;;  %1631 = vset.pattern.permute.xlu1 %v1866_v43  ;;  %1632 = vset.pattern.permute.xlu2 %v1868_v42  ;;  %v933_v43 = vadd.f32 1e-06, %v2289_v44  ;;  %v1724_v42 = vpop.eup %1723 }
 0x1d6   : > { %1727 = vlog2.f32 %v831_v5  ;;  %1277 = vperm.xlu1 %1631, %v1951_v59   ;;  %1321 = vperm.xlu2 %1632, %v1956_v63   ;;  %v2302_v7 = vadd.f32 %v898_v10, %v850_v26  ;;  %v1726_v36 = vpop.eup %1725  ;;  %v891_v20 = vmul.f32 0.6931472, %v1724_v42  ;;  %v984_v24 = vadd.f32 1e-06, %v2306_v32 }
 0x1d7   : > { %v840_v19 = vmul.f32 %v833_v48, %v2161_v34  ;;  %1729 = vlog2.f32 %v933_v43  ;;  %v943_v6 = vmul.f32 0.6931472, %v1726_v36  ;;  %v1077_v43 = vperm.slane %v2314_v41, 1 }
 0x1d8   : > { %v858_v29 = vpop.permute.xlu1 %857  ;;  %v895_v46 = vmul.f32 %v891_v20, %v2161_v34 }
 0x1d9   : > { %v844_v16 = vmul.f32 %v840_v19, %v824_v30  ;;  %v873_v14 = vadd.f32 %v869_v47, %v858_v29  ;;  %v966_v25 = vpop.permute.xlu2 %965  ;;  %v2310_v30 = vmul.f32 0.5, %v1028_v51  ;;  %v947_v9 = vmul.f32 %v943_v6, %v2161_v34 }
 0x1da   : > { %v978_v1 = vadd.f32 %v974_v3, %v966_v25  ;;  %v899_v5 = vmul.f32 %v895_v46, %v2266_v55 }
 0x1db   : > { %v848_v18 = vadd.f32 %v844_v16, %v2224_v56  ;;  %v877_v54 = vmul.f32 0.5, %v873_v14  ;;  %v920_v56 = vperm.slane %v2119_v12, 6  ;;  %v1036_v2 = vadd.f32 1e-06, %v2310_v30 }
 0x1dc   : > { %v1728_v27 = vpop.eup %1727  ;;  %v951_v3 = vmul.f32 %v947_v9, %v2271_v33  ;;  %v2328_v19 = vmul.f32 0.5, %v978_v1  ;;  %v922_v33 = vperm.slane %v2076_v31, 6 }
 0x1dd   : > { %v839_v37 = vmul.f32 0.6931472, %v1728_v27  ;;  %v881_v40 = vadd.f32 1e-06, %v877_v54  ;;  %v2308_v45 = vadd.f32 %v896_v0, %v848_v18  ;;  %v1730_v61 = vpop.eup %1729 }
 0x1de   : > { %1281 = vperm.xlu1 %1631, %v1968_v17   ;;  %1329 = vperm.xlu2 %1632, %v1951_v59   ;;  %v939_v48 = vmul.f32 0.6931472, %v1730_v61  ;;  %v986_v14 = vadd.f32 1e-06, %v2328_v19 }
 0x1df   : > { %v843_v50 = vmul.f32 %v839_v37, %v2161_v34  ;;  %1731 = vlog2.f32 %v881_v40 }
 0x1e0   : > { %1733 = vlog2.f32 %v984_v24  ;;  %v2351_v24 = vmul.f32 %v1994_v60, %v2067_v28  ;;  %v473_v60 = vadd.f32 1e-06, %v1956_v63 }
 0x1e1   : > { %v847_v35 = vmul.f32 %v843_v50, %v827_v21  ;;  %v906_v57 = vpop.permute.xlu1 %905  ;;  %v2332_v21 = vmul.f32 %v2006_v15, %v2083_v39  ;;  %1735 = vlog2.f32 %v1036_v2  ;;  %v945_v15 = vmul.f32 %v939_v48, %v2161_v34 }
 0x1e2   : > { %v924_v4 = vadd.f32 %v920_v56, %v906_v57  ;;  %v1014_v26 = vpop.permute.xlu2 %1013 }
 0x1e3   : > { %v851_v10 = vadd.f32 %v847_v35, %v2268_v52  ;;  %v1029_v11 = vadd.f32 %v1025_v53, %v1014_v26  ;;  %v1066_v52 = vpop.permute.xlu0 %1065  ;;  %v1027_v29 = vperm.slane %v2332_v21, 0  ;;  %v949_v6 = vmul.f32 %v945_v15, %v2289_v44 }
 0x1e4   : > { %v928_v47 = vmul.f32 0.5, %v924_v4  ;;  %v1081_v0 = vadd.f32 %v1077_v43, %v1066_v52  ;;  %v1078_v35 = vperm.slane %v2351_v24, 1 }
 0x1e5   : > { %v1732_v58 = vpop.eup %1731  ;;  %v903_v13 = vadd.f32 %v899_v5, %v851_v10  ;;  %v2353_v53 = vmul.f32 0.5, %v1029_v11 }
 0x1e6   : > { %v887_v55 = vmul.f32 0.6931472, %v1732_v58  ;;  %v932_v42 = vadd.f32 1e-06, %v928_v47  ;;  %1634 = vset.pattern.permute.xlu1 %v1870_v8  ;;  %1333 = vperm.xlu2 %1632, %v1968_v17   ;;  %v1734_v36 = vpop.eup %1733  ;;  %v2347_v50 = vmul.f32 0.5, %v1081_v0 }
 0x1e7   : > { %1373 = vperm.xlu1 %1634, %v1956_v63   ;;  %v2340_v16 = vadd.f32 %v951_v3, %v903_v13  ;;  %v1736_v27 = vpop.eup %1735  ;;  %v989_v40 = vmul.f32 0.6931472, %v1734_v36  ;;  %v1037_v28 = vadd.f32 1e-06, %v2353_v53 }
 0x1e8   : > { %v893_v39 = vmul.f32 %v887_v55, %v2161_v34  ;;  %1737 = vlog2.f32 %v932_v42  ;;  %v1041_v61 = vmul.f32 0.6931472, %v1736_v27  ;;  %v1089_v5 = vadd.f32 1e-06, %v2347_v50 }
 0x1e9   : > { %v914_v25 = vpop.permute.xlu1 %913  ;;  %1739 = vlog2.f32 %v986_v14  ;;  %v996_v57 = vmul.f32 %v989_v40, %v2161_v34  ;;  %v475_v55 = vadd.f32 1e-06, %v1951_v59  ;;  %v1130_v42 = vperm.slane %v2351_v24, 2 }
 0x1ea   : > { %v897_v51 = vmul.f32 %v893_v39, %v877_v54  ;;  %v1022_v1 = vpop.permute.xlu2 %1021  ;;  %v926_v20 = vadd.f32 %v922_v33, %v914_v25  ;;  %v975_v39 = vperm.slane %v2095_v49, 7 }
 0x1eb   : > { %v1031_v18 = vadd.f32 %v1027_v29, %v1022_v1  ;;  %v1000_v13 = vmul.f32 %v996_v57, %v2306_v32  ;;  %v1122_v14 = vpop.permute.xlu0 %1121 }
 0x1ec   : > { %v901_v37 = vadd.f32 %v897_v51, %v2262_v38  ;;  %v930_v56 = vmul.f32 0.5, %v926_v20  ;;  %v973_v38 = vperm.slane %v2107_v62, 7 }
 0x1ed   : > { %v2366_v11 = vmul.f32 0.5, %v1031_v18  ;;  %v1134_v18 = vadd.f32 %v1130_v42, %v1122_v14 }
 0x1ee   : > { %v1738_v46 = vpop.eup %1737  ;;  %v2355_v54 = vadd.f32 %v949_v6, %v901_v37  ;;  %1636 = vset.pattern.permute.xlu2 %v1870_v8  ;;  %v934_v9 = vadd.f32 1e-06, %v930_v56  ;;  %v1048_v8 = vmul.f32 %v1041_v61, %v2161_v34 }
 0x1ef   : > { %v937_v44 = vmul.f32 0.6931472, %v1738_v46  ;;  %v1740_v26 = vpop.eup %1739  ;;  %v1039_v32 = vadd.f32 1e-06, %v2366_v11 }
 0x1f0   : > { %1741 = vlog2.f32 %v934_v9  ;;  %v993_v52 = vmul.f32 0.6931472, %v1740_v26  ;;  %v1026_v26 = vperm.slane %v2351_v24, 0 }
 0x1f1   : > { %v944_v2 = vmul.f32 %v937_v44, %v2161_v34  ;;  %1743 = vlog2.f32 %v473_v60 }
 0x1f2   : > { %v962_v4 = vpop.permute.xlu1 %961  ;;  %1745 = vlog2.f32 %v1037_v28  ;;  %v998_v0 = vmul.f32 %v993_v52, %v2161_v34 }
 0x1f3   : > { %v948_v10 = vmul.f32 %v944_v2, %v928_v47  ;;  %v1070_v48 = vpop.permute.xlu2 %1069  ;;  %v977_v58 = vadd.f32 %v973_v38, %v962_v4  ;;  %v1052_v47 = vmul.f32 %v1048_v8, %v2310_v30  ;;  %1747 = vlog2.f32 %v1089_v5 }
 0x1f4   : > { %v1082_v3 = vadd.f32 %v1078_v35, %v1070_v48  ;;  %1749 = vlog2.f32 %v475_v55  ;;  %v476_v30 = vadd.f32 1e-06, %v1968_v17  ;;  %v1002_v9 = vmul.f32 %v998_v0, %v2328_v19 }
 0x1f5   : > { %v952_v43 = vadd.f32 %v948_v10, %v2308_v45  ;;  %v981_v33 = vmul.f32 0.5, %v977_v58  ;;  %v1128_v35 = vperm.slane %v2286_v23, 2  ;;  %v2385_v2 = vmul.f32 0.5, %v1134_v18 }
 0x1f6   : > { %v1742_v29 = vpop.eup %1741  ;;  %v2380_v61 = vmul.f32 0.5, %v1082_v3 }
 0x1f7   : > { %v1004_v15 = vadd.f32 %v1000_v13, %v952_v43  ;;  %v941_v25 = vmul.f32 0.6931472, %v1742_v29  ;;  %v985_v45 = vadd.f32 1e-06, %v981_v33  ;;  %v1744_v20 = vpop.eup %1743  ;;  %v1142_v13 = vadd.f32 1e-06, %v2385_v2 }
 0x1f8   : > { %v1746_v6 = vpop.eup %1745  ;;  %v478_v5 = vmul.f32 0.6931472, %v1744_v20  ;;  %v1090_v19 = vadd.f32 1e-06, %v2380_v61 }
 0x1f9   : > { %v2375_v36 = vadd.f32 %v1052_v47, %v1004_v15  ;;  %v946_v51 = vmul.f32 %v941_v25, %v2161_v34  ;;  %1751 = vlog2.f32 %v985_v45  ;;  %v1748_v46 = vpop.eup %1747  ;;  %v1043_v60 = vmul.f32 0.6931472, %v1746_v6 }
 0x1fa   : > { %v970_v1 = vpop.permute.xlu1 %969  ;;  %1753 = vlog2.f32 %v1039_v32  ;;  %v1750_v57 = vpop.eup %1749 }
 0x1fb   : > { %v979_v27 = vadd.f32 %v975_v39, %v970_v1  ;;  %v950_v37 = vmul.f32 %v946_v51, %v930_v56  ;;  %1755 = vlog2.f32 %v476_v30  ;;  %v1095_v56 = vmul.f32 0.6931472, %v1748_v46  ;;  %v1178_v46 = vpop.permute.xlu0 %1177 }
 0x1fc   : > { %v1114_v40 = vpop.permute.xlu2 %1113  ;;  %v482_v3 = vmul.f32 0.6931472, %v1750_v57  ;;  %v1049_v43 = vmul.f32 %v1043_v60, %v2161_v34  ;;  %v492_v39 = vmul.f32 %v2161_v34, %v478_v5 }
 0x1fd   : > { %v983_v44 = vmul.f32 0.5, %v979_v27  ;;  %v954_v38 = vadd.f32 %v950_v37, %v2302_v7  ;;  %v1131_v7 = vperm.slane %v2332_v21, 2  ;;  %v1132_v58 = vadd.f32 %v1128_v35, %v1114_v40 }
 0x1fe   : > { %v1101_v29 = vmul.f32 %v1095_v56, %v2161_v34  ;;  %v494_v51 = vmul.f32 %v2161_v34, %v482_v3  ;;  %v1053_v30 = vmul.f32 %v1049_v43, %v2353_v53  ;;  %v1183_v27 = vperm.slane %v2332_v21, 3 }
 0x1ff   : > { %v987_v28 = vadd.f32 1e-06, %v983_v44  ;;  %v1752_v4 = vpop.eup %1751  ;;  %v2388_v8 = vadd.f32 %v1002_v9, %v954_v38  ;;  %v2397_v45 = vmul.f32 0.5, %v1132_v58  ;;  %v1076_v35 = vperm.slane %v2286_v23, 1 }
 0x200   : > { %v991_v10 = vmul.f32 0.6931472, %v1752_v4  ;;  %v1754_v48 = vpop.eup %1753  ;;  %v1105_v40 = vmul.f32 %v1101_v29, %v2347_v50  ;;  %v1187_v4 = vadd.f32 %v1183_v27, %v1178_v46  ;;  %v498_v50 = vmul.f32 %v494_v51, %v1951_v59 }
 0x201   : > { %1757 = vlog2.f32 %v987_v28  ;;  %v1756_v52 = vpop.eup %1755  ;;  %v1047_v14 = vmul.f32 0.6931472, %v1754_v48  ;;  %v1140_v53 = vadd.f32 1e-06, %v2397_v45  ;;  %v1284_v27 = vperm.slane %v2286_v23, 5 }
 0x202   : > { %v997_v55 = vmul.f32 %v991_v10, %v2161_v34  ;;  %1759 = vlog2.f32 %v1090_v19  ;;  %v484_v18 = vmul.f32 0.6931472, %v1756_v52 }
 0x203   : > { %v1018_v42 = vpop.permute.xlu1 %1017  ;;  %1761 = vlog2.f32 %v1142_v13  ;;  %v1051_v9 = vmul.f32 %v1047_v14, %v2161_v34 }
 0x204   : > { %v1030_v47 = vadd.f32 %v1026_v26, %v1018_v42  ;;  %v1126_v15 = vpop.permute.xlu2 %1125  ;;  %v1001_v25 = vmul.f32 %v997_v55, %v981_v33  ;;  %v496_v33 = vmul.f32 %v492_v39, %v1956_v63  ;;  %v495_v48 = vmul.f32 %v2161_v34, %v484_v18 }
 0x205   : > { %v1135_v32 = vadd.f32 %v1131_v7, %v1126_v15  ;;  %v1055_v5 = vmul.f32 %v1051_v9, %v2366_v11  ;;  %v2419_v42 = vmul.f32 0.5, %v1187_v4  ;;  %v506_v11 = vsel %vm215_vm0, %v498_v50, 0.0 }
 0x206   : > { %v1034_v0 = vmul.f32 0.5, %v1030_v47  ;;  %v1005_v20 = vadd.f32 %v1001_v25, %v2355_v54  ;;  %v1181_v54 = vperm.slane %v2314_v41, 3  ;;  %v500_v7 = vsel %vm215_vm0, %v496_v33, 0.0 }
 0x207   : > { %v1758_v1 = vpop.eup %1757  ;;  %v2417_v43 = vmul.f32 0.5, %v1135_v32  ;;  %v1079_v15 = vperm.slane %v2332_v21, 1  ;;  %v499_v39 = vmul.f32 %v495_v48, %v1968_v17  ;;  %v1195_v51 = vadd.f32 1e-06, %v2419_v42 }
 0x208   : > { %v995_v6 = vmul.f32 0.6931472, %v1758_v1  ;;  %v1038_v37 = vadd.f32 1e-06, %v1034_v0  ;;  %v1057_v38 = vadd.f32 %v1053_v30, %v1005_v20  ;;  %v1760_v60 = vpop.eup %1759  ;;  %v1129_v4 = vperm.slane %v2314_v41, 2 }
 0x209   : > { %v1762_v26 = vpop.eup %1761  ;;  %v1097_v58 = vmul.f32 0.6931472, %v1760_v60  ;;  %v1143_v25 = vadd.f32 1e-06, %v2417_v43  ;;  %v509_v33 = vsel %vm215_vm0, %v499_v39, 0.0 }
 0x20a   : > { %v999_v57 = vmul.f32 %v995_v6, %v2161_v34  ;;  %1763 = vlog2.f32 %v1038_v37  ;;  %v2410_v28 = vadd.f32 %v1105_v40, %v1057_v38  ;;  %v1149_v59 = vmul.f32 0.6931472, %v1762_v26  ;;  %v1270_v38 = vpop.permute.xlu0 %1269 }
 0x20b   : > { %1765 = vlog2.f32 %v1140_v53 }
 0x20c   : > { %v1003_v63 = vmul.f32 %v999_v57, %v983_v44  ;;  %v1062_v56 = vpop.permute.xlu1 %1061  ;;  %v1154_v30 = vmul.f32 %v1149_v59, %v2161_v34 }
 0x20d   : > { %v1080_v10 = vadd.f32 %v1076_v35, %v1062_v56  ;;  %v1170_v19 = vpop.permute.xlu2 %1169 }
 0x20e   : > { %v1007_v3 = vadd.f32 %v1003_v63, %v2340_v16  ;;  %v1185_v13 = vadd.f32 %v1181_v54, %v1170_v19  ;;  %v1102_v16 = vmul.f32 %v1097_v58, %v2161_v34  ;;  %v1288_v63 = vadd.f32 %v1284_v27, %v1270_v38 }
 0x20f   : > { %v1084_v44 = vmul.f32 0.5, %v1080_v10  ;;  %501 = vadd.xlane.f32.xlu2 %v500_v7 }
 0x210   : > { %v1764_v55 = vpop.eup %1763  ;;  %v2422_v52 = vadd.f32 %v1055_v5, %v1007_v3  ;;  %v1106_v6 = vmul.f32 %v1102_v16, %v2380_v61  ;;  %v2435_v35 = vmul.f32 0.5, %v1185_v13  ;;  %v1232_v61 = vperm.slane %v2286_v23, 4 }
 0x211   : > { %v1045_v29 = vmul.f32 0.6931472, %v1764_v55  ;;  %v1088_v47 = vadd.f32 1e-06, %v1084_v44  ;;  %507 = vadd.xlane.f32.xlu1 %v506_v11  ;;  %v1766_v32 = vpop.eup %1765  ;;  %v2445_v3 = vmul.f32 0.5, %v1288_v63  ;;  %v1234_v55 = vperm.slane %v2351_v24, 4 }
 0x212   : > { %v1145_v40 = vmul.f32 0.6931472, %v1766_v32  ;;  %v1193_v26 = vadd.f32 1e-06, %v2435_v35  ;;  %v1180_v32 = vperm.slane %v2286_v23, 3  ;;  %v1285_v63 = vperm.slane %v2314_v41, 5 }
 0x213   : > { %v1050_v14 = vmul.f32 %v1045_v29, %v2161_v34  ;;  %1767 = vlog2.f32 %v1088_v47 }
 0x214   : > { %v1074_v1 = vpop.permute.xlu1 %1073  ;;  %1769 = vlog2.f32 %v1143_v25  ;;  %v1296_v25 = vadd.f32 1e-06, %v2445_v3 }
 0x215   : > { %v1054_v20 = vmul.f32 %v1050_v14, %v1034_v0  ;;  %v1083_v18 = vadd.f32 %v1079_v15, %v1074_v1  ;;  %1771 = vlog2.f32 %v1195_v51  ;;  %v1158_v0 = vmul.f32 %v1154_v30, %v2385_v2 }
 0x216   : > { %v1218_v37 = vpop.permute.xlu2 %1217 }
 0x217   : > { %v1058_v46 = vadd.f32 %v1054_v20, %v2388_v8  ;;  %v1087_v9 = vmul.f32 0.5, %v1083_v18  ;;  %510 = vadd.xlane.f32.xlu2 %v509_v33  ;;  %v1152_v8 = vmul.f32 %v1145_v40, %v2161_v34  ;;  %v1236_v10 = vadd.f32 %v1232_v61, %v1218_v37 }
 0x219   : > { %v1768_v57 = vpop.eup %1767  ;;  %v1110_v53 = vadd.f32 %v1106_v6, %v1058_v46  ;;  %v1091_v54 = vadd.f32 1e-06, %v1087_v9  ;;  %v1156_v13 = vmul.f32 %v1152_v8, %v2397_v45  ;;  %v2450_v15 = vmul.f32 0.5, %v1236_v10 }
 0x21a   : > { %v1093_v60 = vmul.f32 0.6931472, %v1768_v57  ;;  %v1770_v5 = vpop.eup %1769  ;;  %v1337_v6 = vperm.slane %v2314_v41, 6  ;;  %v1326_v57 = vpop.permute.xlu0 %1325 }
 0x21b   : > { %1773 = vlog2.f32 %v1091_v54  ;;  %v2441_v56 = vadd.f32 %v1158_v0, %v1110_v53  ;;  %v1772_v19 = vpop.eup %1771  ;;  %v1151_v59 = vmul.f32 0.6931472, %v1770_v5  ;;  %v1244_v1 = vadd.f32 1e-06, %v2450_v15 }
 0x21c   : > { %v1100_v50 = vmul.f32 %v1093_v60, %v2161_v34  ;;  %1775 = vlog2.f32 %v1193_v26  ;;  %v1203_v16 = vmul.f32 0.6931472, %v1772_v19  ;;  %v1341_v8 = vadd.f32 %v1337_v6, %v1326_v57 }
 0x21d   : > { %v1118_v2 = vpop.permute.xlu1 %1117  ;;  %v1155_v45 = vmul.f32 %v1151_v59, %v2161_v34 }
 0x21e   : > { %v1104_v7 = vmul.f32 %v1100_v50, %v1084_v44  ;;  %v1133_v48 = vadd.f32 %v1129_v4, %v1118_v2  ;;  %v1226_v58 = vpop.permute.xlu2 %1225  ;;  %v1207_v20 = vmul.f32 %v1203_v16, %v2161_v34 }
 0x21f   : > { %v1159_v40 = vmul.f32 %v1155_v45, %v2417_v43  ;;  %v1182_v43 = vperm.slane %v2351_v24, 3 }
 0x220   : > { %v1108_v11 = vadd.f32 %v1104_v7, %v2375_v36  ;;  %v1137_v29 = vmul.f32 0.5, %v1133_v48  ;;  %v1238_v36 = vadd.f32 %v1234_v55, %v1226_v58  ;;  %v1211_v61 = vmul.f32 %v1207_v20, %v2419_v42 }
 0x221   : > { %v1774_v47 = vpop.eup %1773  ;;  %v1336_v42 = vperm.slane %v2286_v23, 6  ;;  %v2476_v58 = vmul.f32 0.5, %v1341_v8 }
 0x222   : > { %v1099_v39 = vmul.f32 0.6931472, %v1774_v47  ;;  %v1141_v14 = vadd.f32 1e-06, %v1137_v29  ;;  %v2452_v44 = vadd.f32 %v1156_v13, %v1108_v11  ;;  %v1776_v30 = vpop.eup %1775  ;;  %v2463_v38 = vmul.f32 0.5, %v1238_v36 }
 0x223   : > { %v1199_v0 = vmul.f32 0.6931472, %v1776_v30  ;;  %v1233_v36 = vperm.slane %v2314_v41, 4 }
 0x224   : > { %v1103_v51 = vmul.f32 %v1099_v39, %v2161_v34  ;;  %1777 = vlog2.f32 %v1141_v14  ;;  %v2480_v14 = vpop.xlane.xlu0 %504 }
 0x225   : > { %1779 = vlog2.f32 %v1296_v25  ;;  %v1205_v26 = vmul.f32 %v1199_v0, %v2161_v34 }
 0x226   : > { %v1107_v18 = vmul.f32 %v1103_v51, %v1087_v9  ;;  %v1166_v27 = vpop.permute.xlu1 %1165  ;;  %1781 = vlog2.f32 %v1244_v1 }
 0x227   : > { %v1184_v37 = vadd.f32 %v1180_v32, %v1166_v27  ;;  %v1274_v33 = vpop.permute.xlu2 %1273  ;;  %v1209_v55 = vmul.f32 %v1205_v26, %v2435_v35  ;;  %v1349_v35 = vadd.f32 1e-06, %v2476_v58 }
 0x228   : > { %v1111_v46 = vadd.f32 %v1107_v18, %v2422_v52  ;;  %v1246_v52 = vadd.f32 1e-06, %v2463_v38  ;;  %v1289_v7 = vadd.f32 %v1285_v63, %v1274_v33 }
 0x229   : > { %v1188_v53 = vmul.f32 0.5, %v1184_v37 }
 0x22a   : > { %v1778_v54 = vpop.eup %1777  ;;  %v1163_v9 = vadd.f32 %v1159_v40, %v1111_v46  ;;  %1377 = vperm.xlu1 %1634, %v1973_v22   ;;  %v1390_v46 = vperm.slane %v2351_v24, 7 }
 0x22b   : > { %v1147_v60 = vmul.f32 0.6931472, %v1778_v54  ;;  %v1192_v4 = vadd.f32 1e-06, %v1188_v53  ;;  %v1780_v10 = vpop.eup %1779 }
 0x22c   : > { %v2470_v50 = vadd.f32 %v1211_v61, %v1163_v9  ;;  %v1782_v2 = vpop.eup %1781  ;;  %v1301_v16 = vmul.f32 0.6931472, %v1780_v10  ;;  %v1382_v61 = vpop.permute.xlu0 %1381 }
 0x22d   : > { %v1153_v5 = vmul.f32 %v1147_v60, %v2161_v34  ;;  %1783 = vlog2.f32 %v1192_v4  ;;  %v1249_v39 = vmul.f32 0.6931472, %v1782_v2  ;;  %v1338_v60 = vperm.slane %v2351_v24, 6 }
 0x22e   : > { %v1174_v22 = vpop.permute.xlu1 %1173  ;;  %1785 = vlog2.f32 %v1246_v52  ;;  %v1308_v18 = vmul.f32 %v1301_v16, %v2161_v34  ;;  %v1235_v52 = vperm.slane %v2332_v21, 4 }
 0x22f   : > { %v1157_v19 = vmul.f32 %v1153_v5, %v1137_v29  ;;  %v1186_v48 = vadd.f32 %v1182_v43, %v1174_v22  ;;  %1385 = vperm.xlu2 %1636, %v1968_v17   ;;  %v2482_v29 = vmul.f32 0.5, %v1289_v7  ;;  %v1256_v30 = vmul.f32 %v1249_v39, %v2161_v34 }
 0x230   : > { %v1322_v13 = vpop.permute.xlu2 %1321  ;;  %v1312_v63 = vmul.f32 %v1308_v18, %v2445_v3 }
 0x231   : > { %v1161_v59 = vadd.f32 %v1157_v19, %v2410_v28  ;;  %v1190_v11 = vmul.f32 0.5, %v1186_v48  ;;  %v1340_v47 = vadd.f32 %v1336_v42, %v1322_v13  ;;  %v1297_v27 = vadd.f32 1e-06, %v2482_v29 }
 0x232   : > { %v1260_v0 = vmul.f32 %v1256_v30, %v2450_v15  ;;  %v1394_v42 = vadd.f32 %v1390_v46, %v1382_v61 }
 0x233   : > { %v1784_v25 = vpop.eup %1783  ;;  %v1194_v32 = vadd.f32 1e-06, %v1190_v11  ;;  %v1344_v45 = vmul.f32 0.5, %v1340_v47  ;;  %v2484_v17 = vadd.f32 %v1209_v55, %v1161_v59  ;;  %v1339_v47 = vperm.slane %v2332_v21, 6 }
 0x234   : > { %v1197_v51 = vmul.f32 0.6931472, %v1784_v25  ;;  %v1786_v1 = vpop.eup %1785  ;;  %v2502_v59 = vmul.f32 0.5, %v1394_v42 }
 0x235   : > { %1787 = vlog2.f32 %v1194_v32  ;;  %v1348_v28 = vadd.f32 1e-06, %v1344_v45  ;;  %v1253_v40 = vmul.f32 0.6931472, %v1786_v1 }
 0x236   : > { %v1204_v20 = vmul.f32 %v1197_v51, %v2161_v34 }
 0x237   : > { %1789 = vlog2.f32 %v1348_v28  ;;  %v1222_v6 = vpop.permute.xlu1 %1221  ;;  %v1258_v5 = vmul.f32 %v1253_v40, %v2161_v34  ;;  %v513_v40 = vadd.f32 1e-06, %v2286_v23 }
 0x238   : > { %v1208_v37 = vmul.f32 %v1204_v20, %v1188_v53  ;;  %v1237_v33 = vadd.f32 %v1233_v36, %v1222_v6  ;;  %1791 = vlog2.f32 %v1349_v35  ;;  %v1330_v57 = vpop.permute.xlu2 %1329  ;;  %v1286_v20 = vperm.slane %v2351_v24, 5 }
 0x239   : > { %1793 = vlog2.f32 %v1297_v27  ;;  %v1342_v22 = vadd.f32 %v1338_v60, %v1330_v57  ;;  %v1262_v55 = vmul.f32 %v1258_v5, %v2463_v38  ;;  %v1402_v38 = vadd.f32 1e-06, %v2502_v59 }
 0x23a   : > { %v1212_v54 = vadd.f32 %v1208_v37, %v2452_v44  ;;  %v1241_v9 = vmul.f32 0.5, %v1237_v33  ;;  %v512_v27 = vadd.f32 1e-06, %v2119_v12  ;;  %v517_v60 = vadd.f32 1e-06, %v2351_v24 }
 0x23b   : > { %v1788_v4 = vpop.eup %1787  ;;  %v2506_v25 = vmul.f32 0.5, %v1342_v22 }
 0x23c   : > { %v1264_v43 = vadd.f32 %v1260_v0, %v1212_v54  ;;  %v1201_v53 = vmul.f32 0.6931472, %v1788_v4  ;;  %v1245_v8 = vadd.f32 1e-06, %v1241_v9  ;;  %v516_v0 = vadd.f32 1e-06, %v2076_v31 }
 0x23d   : > { %v1790_v26 = vpop.eup %1789 }
 0x23e   : > { %v1206_v15 = vmul.f32 %v1201_v53, %v2161_v34  ;;  %v1316_v44 = vadd.f32 %v1312_v63, %v1264_v43  ;;  %v1353_v10 = vmul.f32 0.6931472, %v1790_v26  ;;  %v1792_v2 = vpop.eup %1791  ;;  %1795 = vlog2.f32 %v1245_v8 }
 0x23f   : > { %v1230_v19 = vpop.permute.xlu1 %1229  ;;  %v1794_v13 = vpop.eup %1793  ;;  %v1355_v30 = vmul.f32 0.6931472, %v1792_v2  ;;  %v1287_v26 = vperm.slane %v2332_v21, 5 }
 0x240   : > { %v1210_v7 = vmul.f32 %v1206_v15, %v1190_v11  ;;  %v1360_v3 = vmul.f32 %v1353_v10, %v2161_v34  ;;  %v1239_v48 = vadd.f32 %v1235_v52, %v1230_v19  ;;  %v1334_v51 = vpop.permute.xlu2 %1333  ;;  %v1303_v36 = vmul.f32 0.6931472, %v1794_v13 }
 0x241   : > { %v1361_v46 = vmul.f32 %v1355_v30, %v2161_v34 }
 0x242   : > { %v1214_v16 = vadd.f32 %v1210_v7, %v2441_v56  ;;  %v1364_v39 = vmul.f32 %v1360_v3, %v1344_v45  ;;  %v1243_v32 = vmul.f32 0.5, %v1239_v48  ;;  %v1350_v56 = vadd.f32 1e-06, %v2506_v25 }
 0x243   : > { %v1343_v45 = vadd.f32 %v1339_v47, %v1334_v51  ;;  %v1309_v6 = vmul.f32 %v1303_v36, %v2161_v34 }
 0x244   : > { %v2508_v35 = vadd.f32 %v1364_v39, %v1316_v44  ;;  %v1247_v11 = vadd.f32 1e-06, %v1243_v32  ;;  %v2510_v28 = vadd.f32 %v1262_v55, %v1214_v16  ;;  %v1796_v1 = vpop.eup %1795 }
 0x245   : > { %v1251_v18 = vmul.f32 0.6931472, %v1796_v1  ;;  %v2521_v61 = vmul.f32 0.5, %v1343_v45  ;;  %v1313_v43 = vmul.f32 %v1309_v6, %v2482_v29 }
 0x246   : > { %1797 = vlog2.f32 %v1247_v11  ;;  %v1388_v11 = vperm.slane %v2286_v23, 7 }
 0x247   : > { %v1257_v37 = vmul.f32 %v1251_v18, %v2161_v34  ;;  %1799 = vlog2.f32 %v1402_v38  ;;  %v1351_v42 = vadd.f32 1e-06, %v2521_v61 }
 0x248   : > { %v1278_v33 = vpop.permute.xlu1 %1277  ;;  %1801 = vlog2.f32 %v1350_v56 }
 0x249   : > { %v1290_v57 = vadd.f32 %v1286_v20, %v1278_v33  ;;  %v1261_v54 = vmul.f32 %v1257_v37, %v1241_v9  ;;  %1803 = vlog2.f32 %v512_v27  ;;  %v1365_v9 = vmul.f32 %v1361_v46, %v2476_v58 }
 0x24a   : > { %1805 = vlog2.f32 %v513_v40 }
 0x24b   : > { %v1294_v4 = vmul.f32 0.5, %v1290_v57  ;;  %v1265_v53 = vadd.f32 %v1261_v54, %v2484_v17  ;;  %1807 = vlog2.f32 %v516_v0 }
 0x24c   : > { %v1798_v63 = vpop.eup %1797  ;;  %1809 = vlog2.f32 %v517_v60 }
 0x24d   : > { %v1255_v8 = vmul.f32 0.6931472, %v1798_v63  ;;  %v1298_v52 = vadd.f32 1e-06, %v1294_v4  ;;  %v1317_v5 = vadd.f32 %v1313_v43, %v1265_v53  ;;  %v1800_v15 = vpop.eup %1799 }
 0x24e   : > { %v1802_v10 = vpop.eup %1801  ;;  %v1409_v16 = vmul.f32 0.6931472, %v1800_v15 }
 0x24f   : > { %v1259_v44 = vmul.f32 %v1255_v8, %v2161_v34  ;;  %1811 = vlog2.f32 %v1298_v52  ;;  %v2530_v22 = vadd.f32 %v1365_v9, %v1317_v5  ;;  %v1804_v17 = vpop.eup %1803  ;;  %v1357_v55 = vmul.f32 0.6931472, %v1802_v10 }
 0x250   : > { %v1282_v29 = vpop.permute.xlu1 %1281  ;;  %v1806_v7 = vpop.eup %1805  ;;  %1813 = vlog2.f32 %v1351_v42  ;;  %v521_v51 = vmul.f32 0.6931472, %v1804_v17 }
 0x251   : > { %v1263_v2 = vmul.f32 %v1259_v44, %v1243_v32  ;;  %v1291_v19 = vadd.f32 %v1287_v26, %v1282_v29  ;;  %v1808_v3 = vpop.eup %1807  ;;  %v523_v1 = vmul.f32 0.6931472, %v1806_v7  ;;  %v1362_v38 = vmul.f32 %v1357_v55, %v2161_v34 }
 0x252   : > { %v1810_v13 = vpop.eup %1809  ;;  %v529_v30 = vmul.f32 0.6931472, %v1808_v3  ;;  %v536_v45 = vmul.f32 %v521_v51, %v2161_v34  ;;  %v518_v3 = vadd.f32 1e-06, %v2095_v49  ;;  %v514_v51 = vadd.f32 1e-06, %v2107_v62 }
 0x253   : > { %v1267_v58 = vadd.f32 %v1263_v2, %v2470_v50  ;;  %v1295_v48 = vmul.f32 0.5, %v1291_v19  ;;  %v531_v18 = vmul.f32 0.6931472, %v1810_v13  ;;  %v1414_v50 = vmul.f32 %v1409_v16, %v2161_v34 }
 0x254   : > { %v537_v37 = vmul.f32 %v523_v1, %v2161_v34  ;;  %v540_v40 = vmul.f32 %v529_v30, %v2161_v34  ;;  %v1366_v46 = vmul.f32 %v1362_v38, %v2506_v25  ;;  %v544_v43 = vmul.f32 %v536_v45, %v2119_v12 }
 0x255   : > { %v1812_v47 = vpop.eup %1811  ;;  %v1299_v39 = vadd.f32 1e-06, %v1295_v48  ;;  %v541_v54 = vmul.f32 %v531_v18, %v2161_v34  ;;  %v1418_v63 = vmul.f32 %v1414_v50, %v2502_v59  ;;  %v515_v1 = vadd.f32 1e-06, %v2314_v41 }
 0x256   : > { %v1305_v36 = vmul.f32 0.6931472, %v1812_v47  ;;  %v1814_v32 = vpop.eup %1813  ;;  %v545_v52 = vmul.f32 %v537_v37, %v2286_v23  ;;  %v548_v9 = vmul.f32 %v540_v40, %v2076_v31  ;;  %v552_v59 = vsel %vm312_vm10, %v544_v43, 0.0 }
 0x257   : > { %1815 = vlog2.f32 %v1299_v39  ;;  %v1359_v33 = vmul.f32 0.6931472, %v1814_v32 }
 0x258   : > { %v1310_v20 = vmul.f32 %v1305_v36, %v2161_v34  ;;  %v553_v12 = vsel %vm312_vm10, %v545_v52, 0.0  ;;  %v570_v23 = vsel %vm312_vm10, %v548_v9, 0.0 }
 0x259   : > { %v1374_v56 = vpop.permute.xlu1 %1373  ;;  %v1363_v26 = vmul.f32 %v1359_v33, %v2161_v34  ;;  %v554_v31 = vadd.f32 %v553_v12, %v552_v59 }
 0x25a   : > { %v1314_v27 = vmul.f32 %v1310_v20, %v1294_v4  ;;  %v1392_v6 = vadd.f32 %v1388_v11, %v1374_v56 }
 0x25b   : > { %v1367_v15 = vmul.f32 %v1363_v26, %v2521_v61  ;;  %v555_v7 = vrot.slane %v554_v31, 4 }
 0x25c   : > { %v1318_v57 = vadd.f32 %v1314_v27, %v2510_v28  ;;  %v1396_v0 = vmul.f32 0.5, %v1392_v6  ;;  %v549_v28 = vmul.f32 %v541_v54, %v2351_v24 }
 0x25d   : > { %v1816_v60 = vpop.eup %1815  ;;  %v556_v55 = vadd.f32 %v555_v7, %v554_v31 }
 0x25e   : > { %v1370_v53 = vadd.f32 %v1366_v46, %v1318_v57  ;;  %v1307_v4 = vmul.f32 0.6931472, %v1816_v60  ;;  %v1400_v8 = vadd.f32 1e-06, %v1396_v0  ;;  %v571_v10 = vsel %vm312_vm10, %v549_v28, 0.0 }
 0x25f   : > { %v572_v24 = vadd.f32 %v571_v10, %v570_v23  ;;  %v557_v16 = vrot.slane %v556_v55, 2 }
 0x260   : > { %v1311_v25 = vmul.f32 %v1307_v4, %v2161_v34  ;;  %1817 = vlog2.f32 %v1400_v8  ;;  %v2550_v5 = vadd.f32 %v1418_v63, %v1370_v53 }
 0x261   : > { %v573_v61 = vrot.slane %v572_v24, 4  ;;  %1819 = vlog2.f32 %v518_v3  ;;  %v558_v30 = vadd.f32 %v557_v16, %v556_v55 }
 0x262   : > { %v1315_v42 = vmul.f32 %v1311_v25, %v1295_v48  ;;  %v519_v48 = vadd.f32 1e-06, %v2332_v21 }
 0x263   : > { %v574_v47 = vadd.f32 %v573_v61, %v572_v24  ;;  %v559_v18 = vrot.slane %v558_v30, 1 }
 0x264   : > { %v1319_v44 = vadd.f32 %v1315_v42, %v1267_v58  ;;  %1821 = vlog2.f32 %v519_v48 }
 0x265   : > { %v575_v36 = vrot.slane %v574_v47, 2  ;;  %1823 = vlog2.f32 %v514_v51  ;;  %v560_v27 = vadd.f32 %v559_v18, %v558_v30 }
 0x266   : > { %v1818_v29 = vpop.eup %1817  ;;  %v2557_v17 = vadd.f32 %v1367_v15, %v1319_v44  ;;  %1825 = vlog2.f32 %v515_v1 }
 0x267   : > { %v1405_v2 = vmul.f32 0.6931472, %v1818_v29  ;;  %v1820_v39 = vpop.eup %1819  ;;  %v576_v32 = vadd.f32 %v575_v36, %v574_v47  ;;  %v1391_v29 = vperm.slane %v2332_v21, 7 }
 0x268   : > { %v533_v38 = vmul.f32 0.6931472, %v1820_v39 }
 0x269   : > { %v1412_v19 = vmul.f32 %v1405_v2, %v2161_v34 }
 0x26a   : > { %v1822_v11 = vpop.eup %1821  ;;  %v542_v50 = vmul.f32 %v533_v38, %v2161_v34 }
 0x26b   : > { %v1416_v13 = vmul.f32 %v1412_v19, %v1396_v0  ;;  %v535_v20 = vmul.f32 0.6931472, %v1822_v11  ;;  %v1824_v45 = vpop.eup %1823  ;;  %v1428_v0 = vmul.f32 0.5, %v560_v27 }
 0x26c   : > { %v1826_v6 = vpop.eup %1825  ;;  %v550_v33 = vmul.f32 %v542_v50, %v2095_v49  ;;  %v525_v46 = vmul.f32 0.6931472, %v1824_v45 }
 0x26d   : > { %v1420_v58 = vadd.f32 %v1416_v13, %v2508_v35  ;;  %v577_v35 = vrot.slane %v576_v32, 1  ;;  %v543_v56 = vmul.f32 %v535_v20, %v2161_v34  ;;  %v527_v57 = vmul.f32 0.6931472, %v1826_v6 }
 0x26e   : > { %v579_v43 = vsel %vm312_vm10, %v550_v33, 0.0  ;;  %v538_v8 = vmul.f32 %v525_v46, %v2161_v34 }
 0x26f   : > { %v578_v37 = vadd.f32 %v577_v35, %v576_v32  ;;  %v551_v40 = vmul.f32 %v543_v56, %v2332_v21  ;;  %v539_v52 = vmul.f32 %v527_v57, %v2161_v34 }
 0x270   : > { %v546_v42 = vmul.f32 %v538_v8, %v2107_v62 }
 0x271   : > { %v1430_v63 = vmul.f32 0.5, %v578_v37  ;;  %v580_v53 = vsel %vm312_vm10, %v551_v40, 0.0  ;;  %v547_v59 = vmul.f32 %v539_v52, %v2314_v41  ;;  %v1425_v37 = vmul.f32 0.5, %v2480_v14 }
 0x272   : > { %v581_v49 = vadd.f32 %v580_v53, %v579_v43  ;;  %v561_v23 = vsel %vm312_vm10, %v546_v42, 0.0 }
 0x273   : > { %v562_v10 = vsel %vm312_vm10, %v547_v59, 0.0 }
 0x274   : > { %v582_v15 = vrot.slane %v581_v49, 4  ;;  %v563_v2 = vadd.f32 %v562_v10, %v561_v23 }
 0x276   : > { %v583_v31 = vadd.f32 %v582_v15, %v581_v49  ;;  %v564_v62 = vrot.slane %v563_v2, 4 }
 0x278   : > { %v584_v24 = vrot.slane %v583_v31, 2  ;;  %v565_v61 = vadd.f32 %v564_v62, %v563_v2 }
 0x27a   : > { %v585_v48 = vadd.f32 %v584_v24, %v583_v31  ;;  %v566_v55 = vrot.slane %v565_v61, 2 }
 0x27c   : > { %v567_v21 = vadd.f32 %v566_v55, %v565_v61 }
 0x27e   : > { %v568_v20 = vrot.slane %v567_v21, 1 }
 0x280   : > { %v569_v50 = vadd.f32 %v568_v20, %v567_v21 }
 0x282   : > { %v502_v54 = vpop.xlane.xlu2 %501  ;;  %v1429_v6 = vmul.f32 0.5, %v569_v50 }
 0x283   : > { %v1424_v60 = vmul.f32 0.5, %v502_v54 }
 0x284   : > { %v508_v4 = vpop.xlane.xlu1 %507  ;;  %v1433_v46 = vadd.f32 %v1429_v6, %v1425_v37 }
 0x285   : > { %v1432_v26 = vadd.f32 %v1428_v0, %v1424_v60  ;;  %v1426_v9 = vmul.f32 0.5, %v508_v4 }
 0x287   : > { %v1436_v25 = vsub.f32 %v1432_v26, %v1420_v58  ;;  %v1434_v28 = vadd.f32 %v1430_v63, %v1426_v9  ;;  %v586_v58 = vrot.slane %v585_v48, 1 }
 0x289   : > { %1440 = vst.msk [vmem:[%s2578_s24] sm:$0xff] %vm312_vm10, %v1436_v25  ;;  %v1438_v12 = vsub.f32 %v1434_v28, %v2550_v5  ;;  %v1389_v5 = vperm.slane %v2314_v41, 7  ;;  %v587_v39 = vadd.f32 %v586_v58, %v585_v48 }
 0x28a   : > { %v511_v44 = vpop.xlane.xlu2 %510 }
 0x28b   : > { %v1431_v30 = vmul.f32 0.5, %v587_v39  ;;  %v1427_v32 = vmul.f32 0.5, %v511_v44  ;;  %1442 = vst.msk [vmem:[%s2578_s24 + $0x10] sm:$0xff] %vm312_vm10, %v1438_v12 }
 0x28d   : > { %v1435_v41 = vadd.f32 %v1431_v30, %v1427_v32 }
 0x292   : > { %v1386_v19 = vpop.permute.xlu2 %1385 }
 0x293   : > { %v1395_v7 = vadd.f32 %v1391_v29, %v1386_v19 }
 0x295   : > { %v1399_v3 = vmul.f32 0.5, %v1395_v7 }
 0x297   : > { %v1403_v13 = vadd.f32 1e-06, %v1399_v3 }
 0x299   : > { %1827 = vlog2.f32 %v1403_v13 }
 0x29c   : > { %v1378_v47 = vpop.permute.xlu1 %1377 }
 0x29d   : > { %v1393_v16 = vadd.f32 %v1389_v5, %v1378_v47 }
 0x29f   : > { %v1828_v51 = vpop.eup %1827  ;;  %v1397_v36 = vmul.f32 0.5, %v1393_v16 }
 0x2a0   : > { %v1411_v11 = vmul.f32 0.6931472, %v1828_v51 }
 0x2a1   : > { %v1401_v1 = vadd.f32 1e-06, %v1397_v36 }
 0x2a2   : > { %v1415_v38 = vmul.f32 %v1411_v11, %v2161_v34 }
 0x2a3   : > { %1829 = vlog2.f32 %v1401_v1 }
 0x2a4   : > { %v1419_v18 = vmul.f32 %v1415_v38, %v1399_v3 }
 0x2a6   : > { %v1423_v35 = vadd.f32 %v1419_v18, %v2557_v17 }
 0x2a8   : > { %v1439_v56 = vsub.f32 %v1435_v41, %v1423_v35 }
 0x2a9   : > { %v1830_v45 = vpop.eup %1829 }
 0x2aa   : > { %v1407_v27 = vmul.f32 0.6931472, %v1830_v45  ;;  %1443 = vst.msk [vmem:[%s2578_s24 + $0x18] sm:$0xff] %vm312_vm10, %v1439_v56 }
 0x2ac   : > { %v1413_v33 = vmul.f32 %v1407_v27, %v2161_v34 }
 0x2ae   : > { %v1417_v40 = vmul.f32 %v1413_v33, %v1397_v36 }
 0x2b0   : > { %v1421_v57 = vadd.f32 %v1417_v40, %v2530_v22 }
 0x2b2   : > { %v1437_v0 = vsub.f32 %v1433_v46, %v1421_v57 }
 0x2b4   : > { %1441 = vst.msk [vmem:[%s2578_s24 + $0x8] sm:$0xff] %vm312_vm10, %v1437_v0 }
 0x2b5 PF: > { %s12_s11 = sadd.s32 1, %s1853_s11   ;;  %s2612_s9 = smov %s1849_s10 }
 0x2b6   : > { %p9_p5 = scmp.ge.s32.totalorder %s12_s11, 4   ;;  %s2613_s10 = smov %s2615_s12 }
 0x2b8   :  { %11 = sbr.rel (!%p9_p5) target bundleno = 2 (0x2), region = 61 }

</bundles_post_ra>
